<compile_context>
chip_gen: v5e
topology: v5e:2x2
jax: 0.10.0
libtpu: 0.0.40
codegen_flags: <defaults>
</compile_context>

<pallas_src>
import functools

import jax
import jax.numpy as jnp
from jax.experimental import pallas as pl
from jax.experimental.pallas import tpu as pltpu

NEG_SLOPE = 0.1  # LeakyReLU(0.1) as in the PyTorch module


def _round_up(x, m):
    return ((x + m - 1) // m) * m


# ----------------------------------------------------------------------------
# Fused Pallas kernel: the whole MRF (all chains of all ResBlocks) for one
# (batch, time-tile) grid cell.
# ----------------------------------------------------------------------------
def _mrf_kernel(*refs, chain_meta, tile_t, halo, t_real, n_res_blocks):
    xl_ref, xc_ref, xr_ref = refs[0], refs[1], refs[2]
    o_ref = refs[-1]
    wb_refs = refs[3:-1]                       # (w0, b0, w1, b1, ...)

    width = tile_t + 2 * halo
    t0 = pl.program_id(1) * tile_t             # tile start in original time coordinates

    # Halo'd bf16 input window (lane-aligned concat: halo is a multiple of 128).
    x_win = jnp.concatenate([xl_ref[0], xc_ref[0], xr_ref[0]], axis=-1)
    x_f32 = x_win.astype(jnp.float32)

    # Hoisted sequence-boundary mask: positions outside [0, t_real) must be zero before
    # every conv to reproduce PyTorch 'same' zero-padding exactly; it also zeroes the
    # clamped (garbage) left halo of tile 0.  Computed once per tile, sliced per layer.
    pos = t0 - halo + jax.lax.broadcasted_iota(jnp.int32, (1, width), 1)
    mask = ((pos >= 0) & (pos < t_real)).astype(jnp.float32)          # (1, width)

    # First LeakyReLU + mask is identical for every chain -> compute once, share.
    z0 = jnp.where(x_f32 > 0, x_f32, NEG_SLOPE * x_f32) * mask
    z0b = z0.astype(jnp.bfloat16)

    # Skip connections: each ResBlock adds x once -> n_res_blocks * x in total.
    total = n_res_blocks * xc_ref[0].astype(jnp.float32)              # (C, tile_t) f32 acc

    for ci, (dils, K) in enumerate(chain_meta):
        w_ref = wb_refs[2 * ci]                # (L*K, C, C) bf16, tap-major per layer
        b_ref = wb_refs[2 * ci + 1]            # (L, C, 1)   f32
        v = halo                               # halo columns still valid on each side
        y = None
        for l, d in enumerate(dils):
            pad = d * (K - 1) // 2
            if l == 0:
                zb = z0b                       # shared LeakyReLU(x) * mask, full width
            else:
                w_cur = tile_t + 2 * v
                z = jnp.where(y > 0, y, NEG_SLOPE * y)
                z = z * mask[:, halo - v: halo - v + w_cur]
                zb = z.astype(jnp.bfloat16)
            v -= pad
            t_out = tile_t + 2 * v
            # Dilated conv = K per-tap MXU matmuls on shifted views (no im2col temp).
            acc = b_ref[l]                     # (C, 1) f32, broadcasts over time
            for j in range(K):
                acc = acc + jnp.dot(w_ref[l * K + j],
                                    zb[:, j * d: j * d + t_out],
                                    preferred_element_type=jnp.float32)
            y = acc                            # (C, t_out) f32
        total = total + y[:, v: v + tile_t]    # chain output for this tile

    o_ref[0] = (total * (1.0 / n_res_blocks)).astype(o_ref.dtype)


# ----------------------------------------------------------------------------
# Parameter preparation (hoisted out of the forward pass).
# ----------------------------------------------------------------------------
def weight_norm_weight(v_oik, g_o):
    norm = jnp.sqrt(jnp.sum(v_oik * v_oik, axis=(1, 2), keepdims=True))
    return g_o[:, None, None] * v_oik / norm                 # (O, I, K)


def prepare_mrf_weights(params, *, compute_dtype=jnp.bfloat16):
    """Hoist weight_norm + layout transforms out of the per-forward loop.

    Returns (chains, n_res_blocks); each chain dict holds
      w: (L*K, C, C) bf16 per-tap matrices (tap-major within a layer),
      b: (L, C, 1) f32 biases, dils: per-layer dilations, K: kernel size.
    """
    chains = []
    for block_params in params:                 # per ResBlock
        for layer_params in block_params:       # per sequential branch (dilation chain)
            K = int(layer_params[0]["v"].shape[2])
            assert K % 2 == 1, "'same' padding d*(K-1)//2 is exact only for odd K"
            ws, bs, dils = [], [], []
            for p in layer_params:
                w_oik = weight_norm_weight(p["v"], p["g"])              # (O, I, K)
                ws.append(jnp.transpose(w_oik, (2, 0, 1)))              # (K, O, I)
                bs.append(p["b"])
                dils.append(int(p["dilation"]))
            w = jnp.concatenate(ws, axis=0).astype(compute_dtype)       # (L*K, O, I)
            b = jnp.stack(bs)[:, :, None].astype(jnp.float32)           # (L, O, 1)
            chains.append(dict(w=w, b=b, dils=tuple(dils), K=K))
    return chains, len(params)


def init_mrf_params(key, hid, k_r, d_r):
    """Deterministic synthetic parameters matching MRF(hid, k_r, d_r)."""
    params = []
    for i in range(len(k_r)):
        kernel_size = k_r[i]
        block_params = []
        for dils in d_r[i]:
            layer_params = []
            for d in dils:
                key, k1, k2, k3 = jax.random.split(key, 4)
                v = jax.random.normal(k1, (hid, hid, kernel_size), jnp.float32) * 0.05
                g = jax.random.uniform(k2, (hid,), jnp.float32, 0.5, 1.5)
                b = jax.random.normal(k3, (hid,), jnp.float32) * 0.01
                layer_params.append({"v": v, "g": g, "b": b, "dilation": int(d)})
            block_params.append(layer_params)
        params.append(block_params)
    return params


# ----------------------------------------------------------------------------
# MRF forward: one fused pallas_call over grid = (B, n_time_tiles).
# ----------------------------------------------------------------------------
def mrf_forward(x_bct, chains, n_res_blocks, *, max_tile_t=2048):
    """x_bct: (B, C, T) like the PyTorch module. Returns (B, C, T) in x.dtype."""
    B, C, T = x_bct.shape

    # Largest receptive halo any chain needs.
    need = max(sum(d * (ch["K"] - 1) // 2 for d in ch["dils"]) for ch in chains)

    tile_t = min(max_tile_t, _round_up(T, 128))
    tile_t = max(tile_t, _round_up(need, 128))        # auto-grow so the halo always fits
    n_tiles = _round_up(T, tile_t) // tile_t
    t_grid = n_tiles * tile_t

    halo = 128
    while halo < need or tile_t % halo != 0:
        halo += 128
        assert halo <= tile_t, "internal error: halo search exceeded tile_t"
    r = tile_t // halo                                # halo-sized blocks per time tile

    # bf16 storage; back pad covers grid round-up + the right halo of the last tile.
    # No front pad: the left-halo index is clamped to block 0 and pos>=0 masks it.
    x_pad = jnp.pad(x_bct.astype(jnp.bfloat16),
                    ((0, 0), (0, 0), (0, t_grid - T + halo)))

    chain_meta = tuple((ch["dils"], ch["K"]) for ch in chains)
    kernel = functools.partial(_mrf_kernel, chain_meta=chain_meta, tile_t=tile_t,
                               halo=halo, t_real=T, n_res_blocks=n_res_blocks)

    # For time-tile t (start t*tile_t):
    #   left halo  = x[:, :, t*tile_t - halo : t*tile_t]        (halo-block t*r - 1, clamped)
    #   center     = x[:, :, t*tile_t        : (t+1)*tile_t]
    #   right halo = x[:, :, (t+1)*tile_t    : (t+1)*tile_t + halo]
    x_specs = [
        pl.BlockSpec((1, C, halo),   lambda b, t: (b, 0, jnp.maximum(t * r - 1, 0))),
        pl.BlockSpec((1, C, tile_t), lambda b, t: (b, 0, t)),
        pl.BlockSpec((1, C, halo),   lambda b, t: (b, 0, (t + 1) * r)),
    ]
    wb_specs, wb_args = [], []
    for ch in chains:
        wb_specs.append(pl.BlockSpec(ch["w"].shape, lambda b, t: (0, 0, 0)))  # VMEM-resident
        wb_specs.append(pl.BlockSpec(ch["b"].shape, lambda b, t: (0, 0, 0)))
        wb_args.extend([ch["w"], ch["b"]])

    out = pl.pallas_call(
        kernel,
        out_shape=jax.ShapeDtypeStruct((B, C, t_grid), x_bct.dtype),
        grid=(B, n_tiles),
        in_specs=x_specs + wb_specs,
        out_specs=pl.BlockSpec((1, C, tile_t), lambda b, t: (b, 0, t)),
        compiler_params=pltpu.CompilerParams(
            dimension_semantics=("parallel", "parallel"),
            vmem_limit_bytes=48 * 1024 * 1024),
    )(x_pad, x_pad, x_pad, *wb_args)
    return out[:, :, :T]


# ----------------------------------------------------------------------------
# Pure-JAX f32 reference (correctness check only).
# ----------------------------------------------------------------------------
def _ref_conv_lrelu(x_bct, w_oik, bias, dilation):
    y = jnp.where(x_bct > 0, x_bct, NEG_SLOPE * x_bct)
    pad = dilation * (w_oik.shape[2] - 1) // 2
    out = jax.lax.conv_general_dilated(
        y, w_oik, window_strides=(1,), padding=[(pad, pad)],
        rhs_dilation=(dilation,), dimension_numbers=("NCH", "OIH", "NCH"))
    return out + bias[None, :, None]


def _ref_mrf(x_bct, params):
    total = jnp.zeros_like(x_bct)
    for block_params in params:
        res_out = jnp.zeros_like(x_bct)
        for layer_params in block_params:
            h = x_bct
            for p in layer_params:
                w_oik = weight_norm_weight(p["v"], p["g"])
                h = _ref_conv_lrelu(h, w_oik, p["b"], p["dilation"])
            res_out = res_out + h
        total = total + res_out + x_bct
    return total / len(params)


if __name__ == "__main__":
    # Small config: hid channels, two kernel sizes, nested dilation lists (HiFi-GAN style).
    hid, B, T = 32, 2, 64
    k_r = [3, 5]
    d_r = [[[1, 2], [3, 1]], [[1], [3]]]

    key = jax.random.PRNGKey(0)
    key, kx, kp = jax.random.split(key, 3)
    x = jax.random.normal(kx, (B, hid, T), jnp.float32)      # PyTorch Conv1d layout (B, C, T)
    params = init_mrf_params(kp, hid, k_r, d_r)

    chains, n_rb = prepare_mrf_weights(params)               # hoisted weight_norm + layout
    fwd = jax.jit(lambda xb: mrf_forward(xb, chains, n_rb))

    out = fwd(x)
    jax.block_until_ready(out)

    ref = _ref_mrf(x, params)
    jax.block_until_ready(ref)

    assert out.shape == x.shape and out.dtype == x.dtype
    # bf16 storage with f32 accumulation: expected deviation from the f32 reference is
    # O(1e-2) for this config; a real indexing/fusion bug would be O(1).
    assert jnp.allclose(out, ref, atol=5e-2, rtol=5e-2), "Pallas MRF mismatch vs reference"
    print("KERNEL_OK")
</pallas_src>

<mosaic_0001>
module attributes {stable_mosaic.version = 11 : i64} {
  func.func @_mrf_kernel(%arg0: i32, %arg1: i32, %arg2: memref<1x32x128xbf16, #tpu.memory_space<vmem>>, %arg3: memref<1x32x128xbf16, #tpu.memory_space<vmem>>, %arg4: memref<1x32x128xbf16, #tpu.memory_space<vmem>>, %arg5: memref<6x32x32xbf16, #tpu.memory_space<vmem>>, %arg6: memref<2x32x1xf32, #tpu.memory_space<vmem>>, %arg7: memref<6x32x32xbf16, #tpu.memory_space<vmem>>, %arg8: memref<2x32x1xf32, #tpu.memory_space<vmem>>, %arg9: memref<5x32x32xbf16, #tpu.memory_space<vmem>>, %arg10: memref<1x32x1xf32, #tpu.memory_space<vmem>>, %arg11: memref<5x32x32xbf16, #tpu.memory_space<vmem>>, %arg12: memref<1x32x1xf32, #tpu.memory_space<vmem>>, %arg13: memref<1x32x128xf32, #tpu.memory_space<vmem>>) attributes {dimension_semantics = [#tpu.dimension_semantics<parallel>, #tpu.dimension_semantics<parallel>], iteration_bounds = array<i64: 2, 1>, scalar_prefetch = 0 : i64, scratch_operands = 0 : i64, tpu.core_type = #tpu.core_type<tc>, window_params = [{transform_indices = @transform_0, window_bounds = array<i64: 1, 32, 128>}, {transform_indices = @transform_1, window_bounds = array<i64: 1, 32, 128>}, {transform_indices = @transform_2, window_bounds = array<i64: 1, 32, 128>}, {pipeline_mode = #tpu.pipeline_mode<synchronous>, transform_indices = @transform_3, window_bounds = array<i64: 6, 32, 32>}, {pipeline_mode = #tpu.pipeline_mode<synchronous>, transform_indices = @transform_4, window_bounds = array<i64: 2, 32, 1>}, {pipeline_mode = #tpu.pipeline_mode<synchronous>, transform_indices = @transform_5, window_bounds = array<i64: 6, 32, 32>}, {pipeline_mode = #tpu.pipeline_mode<synchronous>, transform_indices = @transform_6, window_bounds = array<i64: 2, 32, 1>}, {pipeline_mode = #tpu.pipeline_mode<synchronous>, transform_indices = @transform_7, window_bounds = array<i64: 5, 32, 32>}, {pipeline_mode = #tpu.pipeline_mode<synchronous>, transform_indices = @transform_8, window_bounds = array<i64: 1, 32, 1>}, {pipeline_mode = #tpu.pipeline_mode<synchronous>, transform_indices = @transform_9, window_bounds = array<i64: 5, 32, 32>}, {pipeline_mode = #tpu.pipeline_mode<synchronous>, transform_indices = @transform_10, window_bounds = array<i64: 1, 32, 1>}, {transform_indices = @transform_11, window_bounds = array<i64: 1, 32, 128>}]} {
    %c128_i32 = arith.constant 128 : i32
    %0 = arith.muli %arg1, %c128_i32 : i32
    %c0 = arith.constant 0 : index
    %c0_0 = arith.constant 0 : index
    %c0_1 = arith.constant 0 : index
    %1 = vector.load %arg2[%c0, %c0_0, %c0_1] : memref<1x32x128xbf16, #tpu.memory_space<vmem>>, vector<1x32x128xbf16>
    %2 = vector.shape_cast %1 : vector<1x32x128xbf16> to vector<32x128xbf16>
    %c0_2 = arith.constant 0 : index
    %c0_3 = arith.constant 0 : index
    %c0_4 = arith.constant 0 : index
    %3 = vector.load %arg3[%c0_2, %c0_3, %c0_4] : memref<1x32x128xbf16, #tpu.memory_space<vmem>>, vector<1x32x128xbf16>
    %4 = vector.shape_cast %3 : vector<1x32x128xbf16> to vector<32x128xbf16>
    %c0_5 = arith.constant 0 : index
    %c0_6 = arith.constant 0 : index
    %c0_7 = arith.constant 0 : index
    %5 = vector.load %arg4[%c0_5, %c0_6, %c0_7] : memref<1x32x128xbf16, #tpu.memory_space<vmem>>, vector<1x32x128xbf16>
    %6 = vector.shape_cast %5 : vector<1x32x128xbf16> to vector<32x128xbf16>
    %7 = tpu.concatenate %2, %4, %6 in 1 : vector<32x128xbf16>, vector<32x128xbf16>, vector<32x128xbf16> -> vector<32x384xbf16>
    %8 = arith.extf %7 : vector<32x384xbf16> to vector<32x384xf32>
    %c128_i32_8 = arith.constant 128 : i32
    %9 = arith.subi %0, %c128_i32_8 : i32
    %10 = tpu.iota {dimensions = array<i32: 1>} : vector<1x384xi32>
    %11 = vector.broadcast %9 : i32 to vector<1x384xi32>
    %12 = arith.addi %11, %10 : vector<1x384xi32>
    %c0_i32 = arith.constant 0 : i32
    %13 = vector.broadcast %c0_i32 : i32 to vector<1x384xi32>
    %14 = arith.cmpi sge, %12, %13 : vector<1x384xi32>
    %c64_i32 = arith.constant 64 : i32
    %15 = vector.broadcast %c64_i32 : i32 to vector<1x384xi32>
    %16 = arith.cmpi slt, %12, %15 : vector<1x384xi32>
    %17 = arith.andi %14, %16 : vector<1x384xi1>
    %18 = arith.extui %17 : vector<1x384xi1> to vector<1x384xi32>
    %19 = arith.sitofp %18 : vector<1x384xi32> to vector<1x384xf32>
    %cst = arith.constant 0.000000e+00 : f32
    %20 = vector.broadcast %cst : f32 to vector<32x384xf32>
    %21 = arith.cmpf ogt, %8, %20 : vector<32x384xf32>
    %cst_9 = arith.constant 1.000000e-01 : f32
    %22 = vector.broadcast %cst_9 : f32 to vector<32x384xf32>
    %23 = arith.mulf %22, %8 : vector<32x384xf32>
    %24 = arith.select %21, %8, %23 : vector<32x384xi1>, vector<32x384xf32>
    %25 = vector.broadcast %19 : vector<1x384xf32> to vector<32x384xf32>
    %26 = arith.mulf %24, %25 : vector<32x384xf32>
    %27 = arith.truncf %26 : vector<32x384xf32> to vector<32x384xbf16>
    %c0_10 = arith.constant 0 : index
    %c0_11 = arith.constant 0 : index
    %c0_12 = arith.constant 0 : index
    %28 = vector.load %arg3[%c0_10, %c0_11, %c0_12] : memref<1x32x128xbf16, #tpu.memory_space<vmem>>, vector<1x32x128xbf16>
    %29 = vector.shape_cast %28 : vector<1x32x128xbf16> to vector<32x128xbf16>
    %30 = arith.extf %29 : vector<32x128xbf16> to vector<32x128xf32>
    %cst_13 = arith.constant 2.000000e+00 : f32
    %31 = vector.broadcast %cst_13 : f32 to vector<32x128xf32>
    %32 = arith.mulf %31, %30 : vector<32x128xf32>
    %c0_14 = arith.constant 0 : index
    %c0_15 = arith.constant 0 : index
    %c0_16 = arith.constant 0 : index
    %33 = vector.load %arg6[%c0_14, %c0_15, %c0_16] : memref<2x32x1xf32, #tpu.memory_space<vmem>>, vector<1x32x1xf32>
    %34 = vector.shape_cast %33 : vector<1x32x1xf32> to vector<32x1xf32>
    %c0_17 = arith.constant 0 : index
    %c0_18 = arith.constant 0 : index
    %c0_19 = arith.constant 0 : index
    %35 = vector.load %arg5[%c0_17, %c0_18, %c0_19] : memref<6x32x32xbf16, #tpu.memory_space<vmem>>, vector<1x32x32xbf16>
    %36 = vector.shape_cast %35 : vector<1x32x32xbf16> to vector<32x32xbf16>
    %37 = vector.extract_strided_slice %27 {offsets = [0, 0], sizes = [32, 382], strides = [1, 1]} : vector<32x384xbf16> to vector<32x382xbf16>
    %cst_20 = arith.constant dense<0.000000e+00> : vector<32x382xf32>
    %38 = tpu.matmul %36, %37, %cst_20 {dimension_numbers = #tpu.dot_dimension_numbers<[1], [0], [0], [1], [0, 0, 1, 1], [], []>} : vector<32x32xbf16>, vector<32x382xbf16>, vector<32x382xf32> -> vector<32x382xf32>
    %39 = vector.broadcast %34 : vector<32x1xf32> to vector<32x382xf32>
    %40 = arith.addf %39, %38 : vector<32x382xf32>
    %c1 = arith.constant 1 : index
    %c0_21 = arith.constant 0 : index
    %c0_22 = arith.constant 0 : index
    %41 = vector.load %arg5[%c1, %c0_21, %c0_22] : memref<6x32x32xbf16, #tpu.memory_space<vmem>>, vector<1x32x32xbf16>
    %42 = vector.shape_cast %41 : vector<1x32x32xbf16> to vector<32x32xbf16>
    %43 = vector.extract_strided_slice %27 {offsets = [0, 1], sizes = [32, 382], strides = [1, 1]} : vector<32x384xbf16> to vector<32x382xbf16>
    %cst_23 = arith.constant dense<0.000000e+00> : vector<32x382xf32>
    %44 = tpu.matmul %42, %43, %cst_23 {dimension_numbers = #tpu.dot_dimension_numbers<[1], [0], [0], [1], [0, 0, 1, 1], [], []>} : vector<32x32xbf16>, vector<32x382xbf16>, vector<32x382xf32> -> vector<32x382xf32>
    %45 = arith.addf %40, %44 : vector<32x382xf32>
    %c2 = arith.constant 2 : index
    %c0_24 = arith.constant 0 : index
    %c0_25 = arith.constant 0 : index
    %46 = vector.load %arg5[%c2, %c0_24, %c0_25] : memref<6x32x32xbf16, #tpu.memory_space<vmem>>, vector<1x32x32xbf16>
    %47 = vector.shape_cast %46 : vector<1x32x32xbf16> to vector<32x32xbf16>
    %48 = vector.extract_strided_slice %27 {offsets = [0, 2], sizes = [32, 382], strides = [1, 1]} : vector<32x384xbf16> to vector<32x382xbf16>
    %cst_26 = arith.constant dense<0.000000e+00> : vector<32x382xf32>
    %49 = tpu.matmul %47, %48, %cst_26 {dimension_numbers = #tpu.dot_dimension_numbers<[1], [0], [0], [1], [0, 0, 1, 1], [], []>} : vector<32x32xbf16>, vector<32x382xbf16>, vector<32x382xf32> -> vector<32x382xf32>
    %50 = arith.addf %45, %49 : vector<32x382xf32>
    %cst_27 = arith.constant 0.000000e+00 : f32
    %51 = vector.broadcast %cst_27 : f32 to vector<32x382xf32>
    %52 = arith.cmpf ogt, %50, %51 : vector<32x382xf32>
    %cst_28 = arith.constant 1.000000e-01 : f32
    %53 = vector.broadcast %cst_28 : f32 to vector<32x382xf32>
    %54 = arith.mulf %53, %50 : vector<32x382xf32>
    %55 = arith.select %52, %50, %54 : vector<32x382xi1>, vector<32x382xf32>
    %56 = vector.extract_strided_slice %19 {offsets = [0, 1], sizes = [1, 382], strides = [1, 1]} : vector<1x384xf32> to vector<1x382xf32>
    %57 = vector.broadcast %56 : vector<1x382xf32> to vector<32x382xf32>
    %58 = arith.mulf %55, %57 : vector<32x382xf32>
    %59 = arith.truncf %58 : vector<32x382xf32> to vector<32x382xbf16>
    %c1_29 = arith.constant 1 : index
    %c0_30 = arith.constant 0 : index
    %c0_31 = arith.constant 0 : index
    %60 = vector.load %arg6[%c1_29, %c0_30, %c0_31] : memref<2x32x1xf32, #tpu.memory_space<vmem>>, vector<1x32x1xf32>
    %61 = vector.shape_cast %60 : vector<1x32x1xf32> to vector<32x1xf32>
    %c3 = arith.constant 3 : index
    %c0_32 = arith.constant 0 : index
    %c0_33 = arith.constant 0 : index
    %62 = vector.load %arg5[%c3, %c0_32, %c0_33] : memref<6x32x32xbf16, #tpu.memory_space<vmem>>, vector<1x32x32xbf16>
    %63 = vector.shape_cast %62 : vector<1x32x32xbf16> to vector<32x32xbf16>
    %64 = vector.extract_strided_slice %59 {offsets = [0, 0], sizes = [32, 378], strides = [1, 1]} : vector<32x382xbf16> to vector<32x378xbf16>
    %cst_34 = arith.constant dense<0.000000e+00> : vector<32x378xf32>
    %65 = tpu.matmul %63, %64, %cst_34 {dimension_numbers = #tpu.dot_dimension_numbers<[1], [0], [0], [1], [0, 0, 1, 1], [], []>} : vector<32x32xbf16>, vector<32x378xbf16>, vector<32x378xf32> -> vector<32x378xf32>
    %66 = vector.broadcast %61 : vector<32x1xf32> to vector<32x378xf32>
    %67 = arith.addf %66, %65 : vector<32x378xf32>
    %c4 = arith.constant 4 : index
    %c0_35 = arith.constant 0 : index
    %c0_36 = arith.constant 0 : index
    %68 = vector.load %arg5[%c4, %c0_35, %c0_36] : memref<6x32x32xbf16, #tpu.memory_space<vmem>>, vector<1x32x32xbf16>
    %69 = vector.shape_cast %68 : vector<1x32x32xbf16> to vector<32x32xbf16>
    %70 = vector.extract_strided_slice %59 {offsets = [0, 2], sizes = [32, 378], strides = [1, 1]} : vector<32x382xbf16> to vector<32x378xbf16>
    %cst_37 = arith.constant dense<0.000000e+00> : vector<32x378xf32>
    %71 = tpu.matmul %69, %70, %cst_37 {dimension_numbers = #tpu.dot_dimension_numbers<[1], [0], [0], [1], [0, 0, 1, 1], [], []>} : vector<32x32xbf16>, vector<32x378xbf16>, vector<32x378xf32> -> vector<32x378xf32>
    %72 = arith.addf %67, %71 : vector<32x378xf32>
    %c5 = arith.constant 5 : index
    %c0_38 = arith.constant 0 : index
    %c0_39 = arith.constant 0 : index
    %73 = vector.load %arg5[%c5, %c0_38, %c0_39] : memref<6x32x32xbf16, #tpu.memory_space<vmem>>, vector<1x32x32xbf16>
    %74 = vector.shape_cast %73 : vector<1x32x32xbf16> to vector<32x32xbf16>
    %75 = vector.extract_strided_slice %59 {offsets = [0, 4], sizes = [32, 378], strides = [1, 1]} : vector<32x382xbf16> to vector<32x378xbf16>
    %cst_40 = arith.constant dense<0.000000e+00> : vector<32x378xf32>
    %76 = tpu.matmul %74, %75, %cst_40 {dimension_numbers = #tpu.dot_dimension_numbers<[1], [0], [0], [1], [0, 0, 1, 1], [], []>} : vector<32x32xbf16>, vector<32x378xbf16>, vector<32x378xf32> -> vector<32x378xf32>
    %77 = arith.addf %72, %76 : vector<32x378xf32>
    %78 = vector.extract_strided_slice %77 {offsets = [0, 125], sizes = [32, 128], strides = [1, 1]} : vector<32x378xf32> to vector<32x128xf32>
    %79 = arith.addf %32, %78 : vector<32x128xf32>
    %c0_41 = arith.constant 0 : index
    %c0_42 = arith.constant 0 : index
    %c0_43 = arith.constant 0 : index
    %80 = vector.load %arg8[%c0_41, %c0_42, %c0_43] : memref<2x32x1xf32, #tpu.memory_space<vmem>>, vector<1x32x1xf32>
    %81 = vector.shape_cast %80 : vector<1x32x1xf32> to vector<32x1xf32>
    %c0_44 = arith.constant 0 : index
    %c0_45 = arith.constant 0 : index
    %c0_46 = arith.constant 0 : index
    %82 = vector.load %arg7[%c0_44, %c0_45, %c0_46] : memref<6x32x32xbf16, #tpu.memory_space<vmem>>, vector<1x32x32xbf16>
    %83 = vector.shape_cast %82 : vector<1x32x32xbf16> to vector<32x32xbf16>
    %84 = vector.extract_strided_slice %27 {offsets = [0, 0], sizes = [32, 378], strides = [1, 1]} : vector<32x384xbf16> to vector<32x378xbf16>
    %cst_47 = arith.constant dense<0.000000e+00> : vector<32x378xf32>
    %85 = tpu.matmul %83, %84, %cst_47 {dimension_numbers = #tpu.dot_dimension_numbers<[1], [0], [0], [1], [0, 0, 1, 1], [], []>} : vector<32x32xbf16>, vector<32x378xbf16>, vector<32x378xf32> -> vector<32x378xf32>
    %86 = vector.broadcast %81 : vector<32x1xf32> to vector<32x378xf32>
    %87 = arith.addf %86, %85 : vector<32x378xf32>
    %c1_48 = arith.constant 1 : index
    %c0_49 = arith.constant 0 : index
    %c0_50 = arith.constant 0 : index
    %88 = vector.load %arg7[%c1_48, %c0_49, %c0_50] : memref<6x32x32xbf16, #tpu.memory_space<vmem>>, vector<1x32x32xbf16>
    %89 = vector.shape_cast %88 : vector<1x32x32xbf16> to vector<32x32xbf16>
    %90 = vector.extract_strided_slice %27 {offsets = [0, 3], sizes = [32, 378], strides = [1, 1]} : vector<32x384xbf16> to vector<32x378xbf16>
    %cst_51 = arith.constant dense<0.000000e+00> : vector<32x378xf32>
    %91 = tpu.matmul %89, %90, %cst_51 {dimension_numbers = #tpu.dot_dimension_numbers<[1], [0], [0], [1], [0, 0, 1, 1], [], []>} : vector<32x32xbf16>, vector<32x378xbf16>, vector<32x378xf32> -> vector<32x378xf32>
    %92 = arith.addf %87, %91 : vector<32x378xf32>
    %c2_52 = arith.constant 2 : index
    %c0_53 = arith.constant 0 : index
    %c0_54 = arith.constant 0 : index
    %93 = vector.load %arg7[%c2_52, %c0_53, %c0_54] : memref<6x32x32xbf16, #tpu.memory_space<vmem>>, vector<1x32x32xbf16>
    %94 = vector.shape_cast %93 : vector<1x32x32xbf16> to vector<32x32xbf16>
    %95 = vector.extract_strided_slice %27 {offsets = [0, 6], sizes = [32, 378], strides = [1, 1]} : vector<32x384xbf16> to vector<32x378xbf16>
    %cst_55 = arith.constant dense<0.000000e+00> : vector<32x378xf32>
    %96 = tpu.matmul %94, %95, %cst_55 {dimension_numbers = #tpu.dot_dimension_numbers<[1], [0], [0], [1], [0, 0, 1, 1], [], []>} : vector<32x32xbf16>, vector<32x378xbf16>, vector<32x378xf32> -> vector<32x378xf32>
    %97 = arith.addf %92, %96 : vector<32x378xf32>
    %cst_56 = arith.constant 0.000000e+00 : f32
    %98 = vector.broadcast %cst_56 : f32 to vector<32x378xf32>
    %99 = arith.cmpf ogt, %97, %98 : vector<32x378xf32>
    %cst_57 = arith.constant 1.000000e-01 : f32
    %100 = vector.broadcast %cst_57 : f32 to vector<32x378xf32>
    %101 = arith.mulf %100, %97 : vector<32x378xf32>
    %102 = arith.select %99, %97, %101 : vector<32x378xi1>, vector<32x378xf32>
    %103 = vector.extract_strided_slice %19 {offsets = [0, 3], sizes = [1, 378], strides = [1, 1]} : vector<1x384xf32> to vector<1x378xf32>
    %104 = vector.broadcast %103 : vector<1x378xf32> to vector<32x378xf32>
    %105 = arith.mulf %102, %104 : vector<32x378xf32>
    %106 = arith.truncf %105 : vector<32x378xf32> to vector<32x378xbf16>
    %c1_58 = arith.constant 1 : index
    %c0_59 = arith.constant 0 : index
    %c0_60 = arith.constant 0 : index
    %107 = vector.load %arg8[%c1_58, %c0_59, %c0_60] : memref<2x32x1xf32, #tpu.memory_space<vmem>>, vector<1x32x1xf32>
    %108 = vector.shape_cast %107 : vector<1x32x1xf32> to vector<32x1xf32>
    %c3_61 = arith.constant 3 : index
    %c0_62 = arith.constant 0 : index
    %c0_63 = arith.constant 0 : index
    %109 = vector.load %arg7[%c3_61, %c0_62, %c0_63] : memref<6x32x32xbf16, #tpu.memory_space<vmem>>, vector<1x32x32xbf16>
    %110 = vector.shape_cast %109 : vector<1x32x32xbf16> to vector<32x32xbf16>
    %111 = vector.extract_strided_slice %106 {offsets = [0, 0], sizes = [32, 376], strides = [1, 1]} : vector<32x378xbf16> to vector<32x376xbf16>
    %cst_64 = arith.constant dense<0.000000e+00> : vector<32x376xf32>
    %112 = tpu.matmul %110, %111, %cst_64 {dimension_numbers = #tpu.dot_dimension_numbers<[1], [0], [0], [1], [0, 0, 1, 1], [], []>} : vector<32x32xbf16>, vector<32x376xbf16>, vector<32x376xf32> -> vector<32x376xf32>
    %113 = vector.broadcast %108 : vector<32x1xf32> to vector<32x376xf32>
    %114 = arith.addf %113, %112 : vector<32x376xf32>
    %c4_65 = arith.constant 4 : index
    %c0_66 = arith.constant 0 : index
    %c0_67 = arith.constant 0 : index
    %115 = vector.load %arg7[%c4_65, %c0_66, %c0_67] : memref<6x32x32xbf16, #tpu.memory_space<vmem>>, vector<1x32x32xbf16>
    %116 = vector.shape_cast %115 : vector<1x32x32xbf16> to vector<32x32xbf16>
    %117 = vector.extract_strided_slice %106 {offsets = [0, 1], sizes = [32, 376], strides = [1, 1]} : vector<32x378xbf16> to vector<32x376xbf16>
    %cst_68 = arith.constant dense<0.000000e+00> : vector<32x376xf32>
    %118 = tpu.matmul %116, %117, %cst_68 {dimension_numbers = #tpu.dot_dimension_numbers<[1], [0], [0], [1], [0, 0, 1, 1], [], []>} : vector<32x32xbf16>, vector<32x376xbf16>, vector<32x376xf32> -> vector<32x376xf32>
    %119 = arith.addf %114, %118 : vector<32x376xf32>
    %c5_69 = arith.constant 5 : index
    %c0_70 = arith.constant 0 : index
    %c0_71 = arith.constant 0 : index
    %120 = vector.load %arg7[%c5_69, %c0_70, %c0_71] : memref<6x32x32xbf16, #tpu.memory_space<vmem>>, vector<1x32x32xbf16>
    %121 = vector.shape_cast %120 : vector<1x32x32xbf16> to vector<32x32xbf16>
    %122 = vector.extract_strided_slice %106 {offsets = [0, 2], sizes = [32, 376], strides = [1, 1]} : vector<32x378xbf16> to vector<32x376xbf16>
    %cst_72 = arith.constant dense<0.000000e+00> : vector<32x376xf32>
    %123 = tpu.matmul %121, %122, %cst_72 {dimension_numbers = #tpu.dot_dimension_numbers<[1], [0], [0], [1], [0, 0, 1, 1], [], []>} : vector<32x32xbf16>, vector<32x376xbf16>, vector<32x376xf32> -> vector<32x376xf32>
    %124 = arith.addf %119, %123 : vector<32x376xf32>
    %125 = vector.extract_strided_slice %124 {offsets = [0, 124], sizes = [32, 128], strides = [1, 1]} : vector<32x376xf32> to vector<32x128xf32>
    %126 = arith.addf %79, %125 : vector<32x128xf32>
    %c0_73 = arith.constant 0 : index
    %c0_74 = arith.constant 0 : index
    %c0_75 = arith.constant 0 : index
    %127 = vector.load %arg10[%c0_73, %c0_74, %c0_75] : memref<1x32x1xf32, #tpu.memory_space<vmem>>, vector<1x32x1xf32>
    %128 = vector.shape_cast %127 : vector<1x32x1xf32> to vector<32x1xf32>
    %c0_76 = arith.constant 0 : index
    %c0_77 = arith.constant 0 : index
    %c0_78 = arith.constant 0 : index
    %129 = vector.load %arg9[%c0_76, %c0_77, %c0_78] : memref<5x32x32xbf16, #tpu.memory_space<vmem>>, vector<1x32x32xbf16>
    %130 = vector.shape_cast %129 : vector<1x32x32xbf16> to vector<32x32xbf16>
    %131 = vector.extract_strided_slice %27 {offsets = [0, 0], sizes = [32, 380], strides = [1, 1]} : vector<32x384xbf16> to vector<32x380xbf16>
    %cst_79 = arith.constant dense<0.000000e+00> : vector<32x380xf32>
    %132 = tpu.matmul %130, %131, %cst_79 {dimension_numbers = #tpu.dot_dimension_numbers<[1], [0], [0], [1], [0, 0, 1, 1], [], []>} : vector<32x32xbf16>, vector<32x380xbf16>, vector<32x380xf32> -> vector<32x380xf32>
    %133 = vector.broadcast %128 : vector<32x1xf32> to vector<32x380xf32>
    %134 = arith.addf %133, %132 : vector<32x380xf32>
    %c1_80 = arith.constant 1 : index
    %c0_81 = arith.constant 0 : index
    %c0_82 = arith.constant 0 : index
    %135 = vector.load %arg9[%c1_80, %c0_81, %c0_82] : memref<5x32x32xbf16, #tpu.memory_space<vmem>>, vector<1x32x32xbf16>
    %136 = vector.shape_cast %135 : vector<1x32x32xbf16> to vector<32x32xbf16>
    %137 = vector.extract_strided_slice %27 {offsets = [0, 1], sizes = [32, 380], strides = [1, 1]} : vector<32x384xbf16> to vector<32x380xbf16>
    %cst_83 = arith.constant dense<0.000000e+00> : vector<32x380xf32>
    %138 = tpu.matmul %136, %137, %cst_83 {dimension_numbers = #tpu.dot_dimension_numbers<[1], [0], [0], [1], [0, 0, 1, 1], [], []>} : vector<32x32xbf16>, vector<32x380xbf16>, vector<32x380xf32> -> vector<32x380xf32>
    %139 = arith.addf %134, %138 : vector<32x380xf32>
    %c2_84 = arith.constant 2 : index
    %c0_85 = arith.constant 0 : index
    %c0_86 = arith.constant 0 : index
    %140 = vector.load %arg9[%c2_84, %c0_85, %c0_86] : memref<5x32x32xbf16, #tpu.memory_space<vmem>>, vector<1x32x32xbf16>
    %141 = vector.shape_cast %140 : vector<1x32x32xbf16> to vector<32x32xbf16>
    %142 = vector.extract_strided_slice %27 {offsets = [0, 2], sizes = [32, 380], strides = [1, 1]} : vector<32x384xbf16> to vector<32x380xbf16>
    %cst_87 = arith.constant dense<0.000000e+00> : vector<32x380xf32>
    %143 = tpu.matmul %141, %142, %cst_87 {dimension_numbers = #tpu.dot_dimension_numbers<[1], [0], [0], [1], [0, 0, 1, 1], [], []>} : vector<32x32xbf16>, vector<32x380xbf16>, vector<32x380xf32> -> vector<32x380xf32>
    %144 = arith.addf %139, %143 : vector<32x380xf32>
    %c3_88 = arith.constant 3 : index
    %c0_89 = arith.constant 0 : index
    %c0_90 = arith.constant 0 : index
    %145 = vector.load %arg9[%c3_88, %c0_89, %c0_90] : memref<5x32x32xbf16, #tpu.memory_space<vmem>>, vector<1x32x32xbf16>
    %146 = vector.shape_cast %145 : vector<1x32x32xbf16> to vector<32x32xbf16>
    %147 = vector.extract_strided_slice %27 {offsets = [0, 3], sizes = [32, 380], strides = [1, 1]} : vector<32x384xbf16> to vector<32x380xbf16>
    %cst_91 = arith.constant dense<0.000000e+00> : vector<32x380xf32>
    %148 = tpu.matmul %146, %147, %cst_91 {dimension_numbers = #tpu.dot_dimension_numbers<[1], [0], [0], [1], [0, 0, 1, 1], [], []>} : vector<32x32xbf16>, vector<32x380xbf16>, vector<32x380xf32> -> vector<32x380xf32>
    %149 = arith.addf %144, %148 : vector<32x380xf32>
    %c4_92 = arith.constant 4 : index
    %c0_93 = arith.constant 0 : index
    %c0_94 = arith.constant 0 : index
    %150 = vector.load %arg9[%c4_92, %c0_93, %c0_94] : memref<5x32x32xbf16, #tpu.memory_space<vmem>>, vector<1x32x32xbf16>
    %151 = vector.shape_cast %150 : vector<1x32x32xbf16> to vector<32x32xbf16>
    %152 = vector.extract_strided_slice %27 {offsets = [0, 4], sizes = [32, 380], strides = [1, 1]} : vector<32x384xbf16> to vector<32x380xbf16>
    %cst_95 = arith.constant dense<0.000000e+00> : vector<32x380xf32>
    %153 = tpu.matmul %151, %152, %cst_95 {dimension_numbers = #tpu.dot_dimension_numbers<[1], [0], [0], [1], [0, 0, 1, 1], [], []>} : vector<32x32xbf16>, vector<32x380xbf16>, vector<32x380xf32> -> vector<32x380xf32>
    %154 = arith.addf %149, %153 : vector<32x380xf32>
    %155 = vector.extract_strided_slice %154 {offsets = [0, 126], sizes = [32, 128], strides = [1, 1]} : vector<32x380xf32> to vector<32x128xf32>
    %156 = arith.addf %126, %155 : vector<32x128xf32>
    %c0_96 = arith.constant 0 : index
    %c0_97 = arith.constant 0 : index
    %c0_98 = arith.constant 0 : index
    %157 = vector.load %arg12[%c0_96, %c0_97, %c0_98] : memref<1x32x1xf32, #tpu.memory_space<vmem>>, vector<1x32x1xf32>
    %158 = vector.shape_cast %157 : vector<1x32x1xf32> to vector<32x1xf32>
    %c0_99 = arith.constant 0 : index
    %c0_100 = arith.constant 0 : index
    %c0_101 = arith.constant 0 : index
    %159 = vector.load %arg11[%c0_99, %c0_100, %c0_101] : memref<5x32x32xbf16, #tpu.memory_space<vmem>>, vector<1x32x32xbf16>
    %160 = vector.shape_cast %159 : vector<1x32x32xbf16> to vector<32x32xbf16>
    %161 = vector.extract_strided_slice %27 {offsets = [0, 0], sizes = [32, 372], strides = [1, 1]} : vector<32x384xbf16> to vector<32x372xbf16>
    %cst_102 = arith.constant dense<0.000000e+00> : vector<32x372xf32>
    %162 = tpu.matmul %160, %161, %cst_102 {dimension_numbers = #tpu.dot_dimension_numbers<[1], [0], [0], [1], [0, 0, 1, 1], [], []>} : vector<32x32xbf16>, vector<32x372xbf16>, vector<32x372xf32> -> vector<32x372xf32>
    %163 = vector.broadcast %158 : vector<32x1xf32> to vector<32x372xf32>
    %164 = arith.addf %163, %162 : vector<32x372xf32>
    %c1_103 = arith.constant 1 : index
    %c0_104 = arith.constant 0 : index
    %c0_105 = arith.constant 0 : index
    %165 = vector.load %arg11[%c1_103, %c0_104, %c0_105] : memref<5x32x32xbf16, #tpu.memory_space<vmem>>, vector<1x32x32xbf16>
    %166 = vector.shape_cast %165 : vector<1x32x32xbf16> to vector<32x32xbf16>
    %167 = vector.extract_strided_slice %27 {offsets = [0, 3], sizes = [32, 372], strides = [1, 1]} : vector<32x384xbf16> to vector<32x372xbf16>
    %cst_106 = arith.constant dense<0.000000e+00> : vector<32x372xf32>
    %168 = tpu.matmul %166, %167, %cst_106 {dimension_numbers = #tpu.dot_dimension_numbers<[1], [0], [0], [1], [0, 0, 1, 1], [], []>} : vector<32x32xbf16>, vector<32x372xbf16>, vector<32x372xf32> -> vector<32x372xf32>
    %169 = arith.addf %164, %168 : vector<32x372xf32>
    %c2_107 = arith.constant 2 : index
    %c0_108 = arith.constant 0 : index
    %c0_109 = arith.constant 0 : index
    %170 = vector.load %arg11[%c2_107, %c0_108, %c0_109] : memref<5x32x32xbf16, #tpu.memory_space<vmem>>, vector<1x32x32xbf16>
    %171 = vector.shape_cast %170 : vector<1x32x32xbf16> to vector<32x32xbf16>
    %172 = vector.extract_strided_slice %27 {offsets = [0, 6], sizes = [32, 372], strides = [1, 1]} : vector<32x384xbf16> to vector<32x372xbf16>
    %cst_110 = arith.constant dense<0.000000e+00> : vector<32x372xf32>
    %173 = tpu.matmul %171, %172, %cst_110 {dimension_numbers = #tpu.dot_dimension_numbers<[1], [0], [0], [1], [0, 0, 1, 1], [], []>} : vector<32x32xbf16>, vector<32x372xbf16>, vector<32x372xf32> -> vector<32x372xf32>
    %174 = arith.addf %169, %173 : vector<32x372xf32>
    %c3_111 = arith.constant 3 : index
    %c0_112 = arith.constant 0 : index
    %c0_113 = arith.constant 0 : index
    %175 = vector.load %arg11[%c3_111, %c0_112, %c0_113] : memref<5x32x32xbf16, #tpu.memory_space<vmem>>, vector<1x32x32xbf16>
    %176 = vector.shape_cast %175 : vector<1x32x32xbf16> to vector<32x32xbf16>
    %177 = vector.extract_strided_slice %27 {offsets = [0, 9], sizes = [32, 372], strides = [1, 1]} : vector<32x384xbf16> to vector<32x372xbf16>
    %cst_114 = arith.constant dense<0.000000e+00> : vector<32x372xf32>
    %178 = tpu.matmul %176, %177, %cst_114 {dimension_numbers = #tpu.dot_dimension_numbers<[1], [0], [0], [1], [0, 0, 1, 1], [], []>} : vector<32x32xbf16>, vector<32x372xbf16>, vector<32x372xf32> -> vector<32x372xf32>
    %179 = arith.addf %174, %178 : vector<32x372xf32>
    %c4_115 = arith.constant 4 : index
    %c0_116 = arith.constant 0 : index
    %c0_117 = arith.constant 0 : index
    %180 = vector.load %arg11[%c4_115, %c0_116, %c0_117] : memref<5x32x32xbf16, #tpu.memory_space<vmem>>, vector<1x32x32xbf16>
    %181 = vector.shape_cast %180 : vector<1x32x32xbf16> to vector<32x32xbf16>
    %182 = vector.extract_strided_slice %27 {offsets = [0, 12], sizes = [32, 372], strides = [1, 1]} : vector<32x384xbf16> to vector<32x372xbf16>
    %cst_118 = arith.constant dense<0.000000e+00> : vector<32x372xf32>
    %183 = tpu.matmul %181, %182, %cst_118 {dimension_numbers = #tpu.dot_dimension_numbers<[1], [0], [0], [1], [0, 0, 1, 1], [], []>} : vector<32x32xbf16>, vector<32x372xbf16>, vector<32x372xf32> -> vector<32x372xf32>
    %184 = arith.addf %179, %183 : vector<32x372xf32>
    %185 = vector.extract_strided_slice %184 {offsets = [0, 122], sizes = [32, 128], strides = [1, 1]} : vector<32x372xf32> to vector<32x128xf32>
    %186 = arith.addf %156, %185 : vector<32x128xf32>
    %cst_119 = arith.constant 5.000000e-01 : f32
    %187 = vector.broadcast %cst_119 : f32 to vector<32x128xf32>
    %188 = arith.mulf %186, %187 : vector<32x128xf32>
    %c0_120 = arith.constant 0 : index
    %c0_121 = arith.constant 0 : index
    %c0_122 = arith.constant 0 : index
    %189 = vector.load %arg13[%c0_120, %c0_121, %c0_122] : memref<1x32x128xf32, #tpu.memory_space<vmem>>, vector<1x32x128xf32>
    %190 = vector.shape_cast %189 : vector<1x32x128xf32> to vector<32x128xf32>
    %191 = vector.shape_cast %188 : vector<32x128xf32> to vector<1x32x128xf32>
    tpu.vector_store %arg13[%c0_120, %c0_121, %c0_122], %191 {strides = array<i32>} : memref<1x32x128xf32, #tpu.memory_space<vmem>>, vector<1x32x128xf32>,
    return
  }
  func.func @transform_0(%arg0: i32, %arg1: i32) -> (i32, i32, i32) {
    %c1_i32 = arith.constant 1 : i32
    %0 = arith.muli %arg1, %c1_i32 : i32
    %c1_i32_0 = arith.constant 1 : i32
    %1 = arith.subi %0, %c1_i32_0 : i32
    %c0_i32 = arith.constant 0 : i32
    %2 = arith.maxsi %1, %c0_i32 : i32
    %c0_i32_1 = arith.constant 0 : i32
    %c0_i32_2 = arith.constant 0 : i32
    return %arg0, %c0_i32_1, %2 : i32, i32, i32
  }
  func.func @transform_1(%arg0: i32, %arg1: i32) -> (i32, i32, i32) {
    %c0_i32 = arith.constant 0 : i32
    %c0_i32_0 = arith.constant 0 : i32
    return %arg0, %c0_i32, %arg1 : i32, i32, i32
  }
  func.func @transform_2(%arg0: i32, %arg1: i32) -> (i32, i32, i32) {
    %c1_i32 = arith.constant 1 : i32
    %0 = arith.addi %arg1, %c1_i32 : i32
    %c1_i32_0 = arith.constant 1 : i32
    %1 = arith.muli %0, %c1_i32_0 : i32
    %c0_i32 = arith.constant 0 : i32
    %c0_i32_1 = arith.constant 0 : i32
    return %arg0, %c0_i32, %1 : i32, i32, i32
  }
  func.func @transform_3(%arg0: i32, %arg1: i32) -> (i32, i32, i32) {
    %c0_i32 = arith.constant 0 : i32
    %c0_i32_0 = arith.constant 0 : i32
    %c0_i32_1 = arith.constant 0 : i32
    %c0_i32_2 = arith.constant 0 : i32
    return %c0_i32, %c0_i32_0, %c0_i32_1 : i32, i32, i32
  }
  func.func @transform_4(%arg0: i32, %arg1: i32) -> (i32, i32, i32) {
    %c0_i32 = arith.constant 0 : i32
    %c0_i32_0 = arith.constant 0 : i32
    %c0_i32_1 = arith.constant 0 : i32
    %c0_i32_2 = arith.constant 0 : i32
    return %c0_i32, %c0_i32_0, %c0_i32_1 : i32, i32, i32
  }
  func.func @transform_5(%arg0: i32, %arg1: i32) -> (i32, i32, i32) {
    %c0_i32 = arith.constant 0 : i32
    %c0_i32_0 = arith.constant 0 : i32
    %c0_i32_1 = arith.constant 0 : i32
    %c0_i32_2 = arith.constant 0 : i32
    return %c0_i32, %c0_i32_0, %c0_i32_1 : i32, i32, i32
  }
  func.func @transform_6(%arg0: i32, %arg1: i32) -> (i32, i32, i32) {
    %c0_i32 = arith.constant 0 : i32
    %c0_i32_0 = arith.constant 0 : i32
    %c0_i32_1 = arith.constant 0 : i32
    %c0_i32_2 = arith.constant 0 : i32
    return %c0_i32, %c0_i32_0, %c0_i32_1 : i32, i32, i32
  }
  func.func @transform_7(%arg0: i32, %arg1: i32) -> (i32, i32, i32) {
    %c0_i32 = arith.constant 0 : i32
    %c0_i32_0 = arith.constant 0 : i32
    %c0_i32_1 = arith.constant 0 : i32
    %c0_i32_2 = arith.constant 0 : i32
    return %c0_i32, %c0_i32_0, %c0_i32_1 : i32, i32, i32
  }
  func.func @transform_8(%arg0: i32, %arg1: i32) -> (i32, i32, i32) {
    %c0_i32 = arith.constant 0 : i32
    %c0_i32_0 = arith.constant 0 : i32
    %c0_i32_1 = arith.constant 0 : i32
    %c0_i32_2 = arith.constant 0 : i32
    return %c0_i32, %c0_i32_0, %c0_i32_1 : i32, i32, i32
  }
  func.func @transform_9(%arg0: i32, %arg1: i32) -> (i32, i32, i32) {
    %c0_i32 = arith.constant 0 : i32
    %c0_i32_0 = arith.constant 0 : i32
    %c0_i32_1 = arith.constant 0 : i32
    %c0_i32_2 = arith.constant 0 : i32
    return %c0_i32, %c0_i32_0, %c0_i32_1 : i32, i32, i32
  }
  func.func @transform_10(%arg0: i32, %arg1: i32) -> (i32, i32, i32) {
    %c0_i32 = arith.constant 0 : i32
    %c0_i32_0 = arith.constant 0 : i32
    %c0_i32_1 = arith.constant 0 : i32
    %c0_i32_2 = arith.constant 0 : i32
    return %c0_i32, %c0_i32_0, %c0_i32_1 : i32, i32, i32
  }
  func.func @transform_11(%arg0: i32, %arg1: i32) -> (i32, i32, i32) {
    %c0_i32 = arith.constant 0 : i32
    %c0_i32_0 = arith.constant 0 : i32
    return %arg0, %c0_i32, %arg1 : i32, i32, i32
  }
}

</mosaic_0001>

<bundles_post_ra>
// kernel: _lambda_.1
= control target key start
LH: loop header
LB: loop body
LE: loop exit
PB: predicated region body
PF: predicated region fallthrough
CT: control target
= control target key end

     0   :  { %s5540_s0 = inlined_call_operand.vmem [shape: bf16[2,32,256], index: 0, kind: input, shape index: {}, may-alias: {0,1,2}]   ;;  %s5541_s1 = inlined_call_operand.vmem [shape: bf16[2,32,256], index: 1, kind: input, shape index: {}, may-alias: {0,1,2}]   ;;  %s5542_s2 = inlined_call_operand.vmem [shape: bf16[2,32,256], index: 2, kind: input, shape index: {}, may-alias: {0,1,2}]   ;;  %s5543_s3 = inlined_call_operand.vmem [shape: bf16[6,32,32], index: 3, kind: input, shape index: {}]   ;;  %s5544_s4 = inlined_call_operand.hbm [shape: f32[2,32,1], index: 4, kind: input, shape index: {}]   ;;  %s5545_s5 = inlined_call_operand.vmem [shape: bf16[6,32,32], index: 5, kind: input, shape index: {}]   ;;  %s5546_s6 = inlined_call_operand.hbm [shape: f32[2,32,1], index: 6, kind: input, shape index: {}]   ;;  %s5547_s7 = inlined_call_operand.hbm [shape: bf16[5,32,32], index: 7, kind: input, shape index: {}]   ;;  %s5548_s8 = inlined_call_operand.hbm [shape: f32[1,32,1], index: 8, kind: input, shape index: {}]   ;;  %s5549_s9 = inlined_call_operand.hbm [shape: bf16[5,32,32], index: 9, kind: input, shape index: {}]   ;;  %s5550_s10 = inlined_call_operand.hbm [shape: f32[1,32,1], index: 10, kind: input, shape index: {}]   ;;  %s5551_s11 = inlined_call_operand.hbm [shape: f32[2,32,128], index: 11, kind: output, shape index: {}]  }
   0x1   :  { %5563 = sst [smem:[#allocation49_spill]] %s5544_s4 }
   0x2   :  { %5564 = sst [smem:[#allocation50_spill]] %s5545_s5 }
   0x3   :  { %5565 = sst [smem:[#allocation51_spill]] %s5546_s6 }
   0x4   :  { %5566 = sst [smem:[#allocation52_spill]] %s5547_s7 }
   0x5   :  { %5567 = sst [smem:[#allocation53_spill]] %s5548_s8 }
   0x6   :  { %5568 = sst [smem:[#allocation54_spill]] %s5551_s11 }
   0x7   :  { %16 = vsyncpa [#allocation6], 0 }
   0x8   :  { %17 = vsyncpa [#allocation9], 0 }
   0x9   :  { %18 = vsyncpa [#allocation12], 0 }
   0xa   :  { %19 = vsyncpa [#allocation15], 0 }
   0xb   :  { %20 = vsyncpa [#allocation7], 0 }
   0xc   :  { %22 = vsyncpa [#allocation7 + $0x1], 0  ;;  %s4404_s17 = smov 0   ;;  %s4406_s18 = smov 0  }
   0xd   :  { %s4408_s19 = smov 0   ;;  %s4410_s20 = smov 0  }
   0xe   :  { %s4412_s21 = smov 0   ;;  %s4414_s22 = smov 0  }
   0xf LB: > { %5569 = sst [smem:[#allocation22_spill]] %s4297_s17  ;;  %s3457_s23 = sadd.s32 4294967295, %s4317_s22   ;;  %s4317_s22 = sphi %s4414_s22, %s28_s22   ;;  %s4313_s21 = sphi %s4412_s21, %s5639_s21   ;;  %s4309_s20 = sphi %s4410_s20, %s5638_s20   ;;  %s4305_s19 = sphi %s4408_s19, %s5637_s19   ;;  %s4301_s18 = sphi %s4406_s18, %s5636_s18   ;;  %s4297_s17 = sphi %s4404_s17, %s5635_s17  }
  0x10   : > { %5570 = sst [smem:[#allocation23_spill]] %s4309_s20  ;;  %s3458_s24 = sadd.s32 4294967294, %s4317_s22  }
  0x11   : > { %s40_s25 = sadd.s32 1, %s4313_s21  ;;  %s55_s26 = sadd.s32 1, %s4305_s19 }
  0x12   : > { %p42_p0 = scmp.ge.s32.totalorder %s40_s25, 2  ;;  %p62_p1 = scmp.ne.s32.totalorder %s4305_s19, %s4301_s18 }
  0x13   : > { %p63_p2 = scmp.eq.s32.totalorder %s4317_s22, 0  ;;  %p320_p3 = scmp.eq.s32.totalorder %s3457_s23, 1 }
  0x14   : > { %s5641_s25 = smov (%p42_p0, %s40_s25), 0  ;;  %p325_p6 = scmp.ne.s32.totalorder %s4301_s18, %s4297_s17 }
  0x15   : > { %5571 = sst [smem:[#allocation24_spill]] %s5641_s25  ;;  %p4443_p4 = por %p63_p2, %p62_p1 }
  0x16   : > { %p4447_p5 = por %p320_p3, %p62_p1  ;;  %s50_s29 = ssub.s32 %s4313_s21, %s5641_s25 }
  0x17   : > { %p53_p7 = scmp.eq.s32.totalorder %s50_s29, 0  ;;  %p326_p8 = scmp.eq.s32.totalorder %s3458_s24, 1 }
  0x18   : > { %s5573_s28 = scalar_select %p4447_p5, 1, 0 }
  0x19   : > { %p3459_p9 = scmp.ge.s32.totalorder %s4317_s22, 1  ;;  %p333_p10 = scmp.lt.s32.totalorder %s4317_s22, 3 }
  0x1a   : > { %5574 = sst [smem:[#allocation25_spill]] %s5573_s28  ;;  %p4460_p11 = por %p326_p8, %p325_p6 }
  0x1b   : > { %s4458_s30 = scalar_select %p53_p7, %s4305_s19, %s55_s26  }
  0x1c   : > { %s5576_s12 = scalar_select %p4460_p11, 1, 0 }
  0x1d   : > { %5575 = sst [smem:[#allocation26_spill]] %s4458_s30  ;;  %p4464_p12 = pnand %p3459_p9, %p333_p10 }
  0x1e   : > { %5577 = sst [smem:[#allocation27_spill]] %s5576_s12  ;;  %p4468_p13 = scmp.eq.s32.totalorder %s3457_s23, 0 }
  0x1f   : > { %p3921_p0 = pneg %p4464_p12  ;;  %s5580_s6 = sld [smem:[#allocation51_spill]] }
  0x20   : > { %s5582_s8 = sld [smem:[#allocation53_spill]]  ;;  %s4319_s30 = smov [#allocation8]  }
  0x21   : > { %p4479_p1 = pnand %p4468_p13, %p3921_p0  ;;  %s366_s12 = sshll.u32 %s4319_s30, 4  ;;  %s367_s12 = int_to_ptr.vmem [resolvable:$true] %s366_s12 }
  0x22   : > { %s4320_s17 = smov 128   ;;  %s4321_s15 = smov 8  }
  0x23   : > { %s4322_s16 = smov [#allocation11]   ;;  %s5583_s4 = sld [smem:[#allocation49_spill]] }
  0x24   : > { %s4323_s30 = smov [#allocation5]   ;;  %s5584_s7 = sld [smem:[#allocation52_spill]] }
  0x25   : > { %s364_s24 = sshll.u32 %s5580_s6, 4  ;;  %s394_s6 = sshll.u32 %s4322_s16, 4  ;;  %s365_s24 = int_to_ptr.hbm [resolvable:$true] %s364_s24  ;;  %s395_s6 = int_to_ptr.vmem [resolvable:$true] %s394_s6 }
  0x26   : > { %s392_s25 = sshll.u32 %s5582_s8, 4  ;;  %s349_s23 = sshll.u32 %s4323_s30, 4  ;;  %s393_s25 = int_to_ptr.hbm [resolvable:$true] %s392_s25  ;;  %s350_s23 = int_to_ptr.vmem [resolvable:$true] %s349_s23 }
  0x27   : > { %3927 = dma.hbm_to_vmem [thread:$0]  (!%p4479_p1), %s365_s24, 1024, %s367_s12, [#allocation9], %s4320_s17, %s4320_s17, %s4321_s15  }
  0x28   : > { %3933 = dma.hbm_to_vmem [thread:$0]  (!%p4479_p1), %s393_s25, 512, %s395_s6, [#allocation12], %s4320_s17, %s4320_s17, %s4321_s15  }
  0x29   : > { %s347_s29 = sshll.u32 %s5583_s4, 4  ;;  %s4324_s11 = smov [#allocation10]   ;;  %s348_s29 = int_to_ptr.hbm [resolvable:$true] %s347_s29 }
  0x2a   : > { %s378_s12 = sshll.u32 %s5584_s7, 4  ;;  %s380_s28 = sshll.u32 %s4324_s11, 4  ;;  %s379_s12 = int_to_ptr.hbm [resolvable:$true] %s378_s12  ;;  %s381_s28 = int_to_ptr.vmem [resolvable:$true] %s380_s28 }
  0x2b   : > { %3924 = dma.hbm_to_vmem [thread:$0]  (!%p4479_p1), %s348_s29, 1024, %s350_s23, [#allocation6], %s4320_s17, %s4320_s17, %s4321_s15  }
  0x2c   : > { %s406_s24 = sshll.u32 %s5549_s9, 4  ;;  %s4325_s16 = smov 64   ;;  %s407_s24 = int_to_ptr.hbm [resolvable:$true] %s406_s24 }
  0x2d   : > { %s4326_s30 = smov 4   ;;  %s4327_s8 = smov [#allocation13]  }
  0x2e   : > { %3930 = dma.hbm_to_vmem [thread:$0]  (!%p4479_p1), %s379_s12, 1280, %s381_s28, [#allocation9], %s4325_s16, %s4325_s16, %s4326_s30  }
  0x2f   : > { %s408_s20 = sshll.u32 %s4327_s8, 4  ;;  %s420_s5 = sshll.u32 %s5550_s10, 4  ;;  %s409_s20 = int_to_ptr.vmem [resolvable:$true] %s408_s20  ;;  %s421_s5 = int_to_ptr.hbm [resolvable:$true] %s420_s5 }
  0x30   : > { %3936 = dma.hbm_to_vmem [thread:$0]  (!%p4479_p1), %s407_s24, 1280, %s409_s20, [#allocation12], %s4325_s16, %s4325_s16, %s4326_s30  }
  0x31   : > { %s4328_s29 = smov [#allocation14]   ;;  %p3466_p2 = scmp.ge.s32.totalorder %s4317_s22, 2 }
  0x32   : > { %s422_s23 = sshll.u32 %s4328_s29, 4  ;;  %s423_s23 = int_to_ptr.vmem [resolvable:$true] %s422_s23 }
  0x33   : > { %3939 = dma.hbm_to_vmem [thread:$0]  (!%p4479_p1), %s421_s5, 512, %s423_s23, [#allocation15], %s4320_s17, %s4320_s17, %s4321_s15  }
  0x34   : > { %432 = sbr.rel (%p3466_p2) target bundleno = 81 (0x51), region = 48 }
  0x39   : > { %435 = sbr.rel (!%p4443_p4) target bundleno = 65 (0x41), region = 52  ;;  %s437_s4 = sand.u32 (%p4443_p4), 1, %s4305_s19  }
  0x3a   : > { %s3837_s7 = sshll.u32 (%p4443_p4), %s4313_s21, 5  ;;  %s3467_s12 = sshll.u32 (%p4443_p4), %s437_s4, 4 }
  0x3b   : > { %s446_s26 = scalar_lea.vmem (%p4443_p4), %s5540_s0, %s3837_s7  ;;  %s439_s5 = scalar_lea.vmem (%p4443_p4), [#allocation2], %s3467_s12 }
  0x3c   : > { %v463_v0 = vld [vmem:[%s446_s26] sm:$0xf] (%p4443_p4)  ;;  %v465_v1 = vld [vmem:[%s446_s26 + $0x8] sm:$0xf] (%p4443_p4)  ;;  %v467_v2 = vld [vmem:[%s446_s26 + $0x10] sm:$0xf] (%p4443_p4) }
  0x3d   : > { %464 = vst [vmem:[%s439_s5] sm:$0xf] (%p4443_p4), %v463_v0  ;;  %v469_v3 = vld [vmem:[%s446_s26 + $0x18] sm:$0xf] (%p4443_p4) }
  0x3e   : > { %466 = vst [vmem:[%s439_s5 + $0x4] sm:$0xf] %v465_v1 }
  0x3f   : > { %468 = vst [vmem:[%s439_s5 + $0x8] sm:$0xf] %v467_v2 }
  0x40   : > { %470 = vst [vmem:[%s439_s5 + $0xc] sm:$0xf] %v469_v3 }
  0x41 PF: > { %502 = sbr.rel (!%p4443_p4) target bundleno = 73 (0x49), region = 93  ;;  %s504_s17 = sand.u32 (%p4443_p4), 1, %s4305_s19  }
  0x42   : > { %s3838_s15 = sshll.u32 (%p4443_p4), %s4313_s21, 5  ;;  %s3470_s6 = sshll.u32 (%p4443_p4), %s504_s17, 4 }
  0x43   : > { %s510_s16 = scalar_lea.vmem (%p4443_p4), %s5541_s1, %s3838_s15  ;;  %s506_s30 = scalar_lea.vmem (%p4443_p4), [#allocation3], %s3470_s6 }
  0x44   : > { %v527_v4 = vld [vmem:[%s510_s16] sm:$0xf] (%p4443_p4)  ;;  %v529_v5 = vld [vmem:[%s510_s16 + $0x8] sm:$0xf] (%p4443_p4)  ;;  %v531_v6 = vld [vmem:[%s510_s16 + $0x10] sm:$0xf] (%p4443_p4) }
  0x45   : > { %528 = vst [vmem:[%s506_s30] sm:$0xf] (%p4443_p4), %v527_v4  ;;  %v533_v7 = vld [vmem:[%s510_s16 + $0x18] sm:$0xf] (%p4443_p4) }
  0x46   : > { %530 = vst [vmem:[%s506_s30 + $0x4] sm:$0xf] %v529_v5 }
  0x47   : > { %532 = vst [vmem:[%s506_s30 + $0x8] sm:$0xf] %v531_v6 }
  0x48   : > { %534 = vst [vmem:[%s506_s30 + $0xc] sm:$0xf] %v533_v7 }
  0x49 PF: > { %566 = sbr.rel (!%p4443_p4) target bundleno = 81 (0x51), region = 134  ;;  %s568_s8 = sand.u32 (%p4443_p4), 1, %s4305_s19  }
  0x4a   : > { %s3839_s20 = sshll.u32 (%p4443_p4), %s4313_s21, 5  ;;  %s3473_s29 = sshll.u32 (%p4443_p4), %s568_s8, 4 }
  0x4b   : > { %s3323_s7 = scalar_lea.vmem (%p4443_p4), %s5542_s2, %s3839_s20  ;;  %s570_s12 = scalar_lea.vmem (%p4443_p4), [#allocation4], %s3473_s29 }
  0x4c   : > { %v3476_v8 = vld [vmem:[%s3323_s7 + $0x4] sm:$0xf] (%p4443_p4)  ;;  %v3477_v9 = vld [vmem:[%s3323_s7 + $0xc] sm:$0xf] (%p4443_p4)  ;;  %v3478_v10 = vld [vmem:[%s3323_s7 + $0x14] sm:$0xf] (%p4443_p4) }
  0x4d   : > { %593 = vst [vmem:[%s570_s12] sm:$0xf] (%p4443_p4), %v3476_v8  ;;  %v3479_v11 = vld [vmem:[%s3323_s7 + $0x1c] sm:$0xf] (%p4443_p4) }
  0x4e   : > { %595 = vst [vmem:[%s570_s12 + $0x4] sm:$0xf] %v3477_v9 }
  0x4f   : > { %597 = vst [vmem:[%s570_s12 + $0x8] sm:$0xf] %v3478_v10 }
  0x50   : > { %599 = vst [vmem:[%s570_s12 + $0xc] sm:$0xf] %v3479_v11 }
  0x51 PF: > { %634 = sbr.rel (%p4464_p12) target bundleno = 1411 (0x583), region = 175 }
  0x56   : > { %s4549_s27 = sand.u32 1, %s4301_s18  }
  0x57   : > { %s4552_s11 = sshll.u32 %s4549_s27, 4 }
  0x58   : > { %s639_s28 = scalar_lea.vmem [#allocation2], %s4552_s11  ;;  %s4556_s26 = scalar_lea.vmem [#allocation3], %s4552_s11 }
  0x59   : > { %s653_s5 = scalar_lea.vmem [#allocation4], %s4552_s11 }
  0x5a   : > { %4276 = dma.done.wait (%p4468_p13), [#allocation6], 1024  }
  0x5b   : > { %4278 = vsyncadd (%p4468_p13), [#allocation6], 4294966272 }
  0x5c   : > { %4280 = dma.done.wait (%p4468_p13), [#allocation9], 2304  }
  0x5d   : > { %4282 = vsyncadd (%p4468_p13), [#allocation9], 4294964992 }
  0x5e   : > { %4284 = dma.done.wait (%p4468_p13), [#allocation12], 1792  }
  0x5f   : > { %4286 = vsyncadd (%p4468_p13), [#allocation12], 4294965504 }
  0x60   : > { %4288 = dma.done.wait (%p4468_p13), [#allocation15], 512  }
  0x61   : > { %4290 = vsyncadd (%p4468_p13), [#allocation15], 4294966784  ;;  %v795_v12 = vlaneseq  ;;  %v3841_v16 = vld [vmem:[%s639_s28 + $0x8] sm:$0xff]  ;;  %v3840_v18 = vld [vmem:[%s639_s28] sm:$0xff]  ;;  %v4329_v24 = vmov 0.0   ;;  %s4330_s13 = smov 127  }
  0x62   : > { %v3843_v17 = vld [vmem:[%s4556_s26 + $0x8] sm:$0xff]  ;;  %v3842_v19 = vld [vmem:[%s4556_s26] sm:$0xff]  ;;  %v788_v20 = vunpack.c.l.bf16 %v3841_v16  ;;  %v791_v22 = vunpack.c.h.bf16 %v3841_v16  ;;  %v782_v26 = vunpack.c.l.bf16 %v3840_v18  ;;  %v785_v28 = vunpack.c.h.bf16 %v3840_v18  ;;  %s4331_s14 = smov 126   ;;  %s4333_s7 = smov 124  }
  0x63   : > { %v796_v13 = vand.u32 127, %v795_v12  ;;  %v789_v21 = vunpack.c.l.bf16 %v3843_v17  ;;  %v792_v23 = vunpack.c.h.bf16 %v3843_v17  ;;  %v783_v27 = vunpack.c.l.bf16 %v3842_v19  ;;  %v3845_v34 = vld [vmem:[%s653_s5 + $0x8] sm:$0xff]  ;;  %v3844_v58 = vld [vmem:[%s653_s5] sm:$0xff]  ;;  %s4334_s12 = smov 125   ;;  %s4335_s11 = smov 122  }
  0x64   : > { %vm824_vm1 = vcmp.gt.f32.partialorder %v788_v20, 0.0  ;;  %vm827_vm3 = vcmp.gt.f32.partialorder %v791_v22, 0.0  ;;  %v836_v29 = vmul.f32 0.1, %v788_v20  ;;  %v839_v31 = vmul.f32 0.1, %v791_v22 }
  0x65   : > { %v797_v14 = vadd.s32 128, %v796_v13  ;;  %vm825_vm2 = vcmp.gt.f32.partialorder %v789_v21, 0.0  ;;  %vm828_vm4 = vcmp.gt.f32.partialorder %v792_v23, 0.0  ;;  %v837_v30 = vmul.f32 0.1, %v789_v21  ;;  %s4338_s24 = smov 3  }
  0x66   : > { %v786_v32 = vunpack.c.h.bf16 %v3842_v19  ;;  %v840_v33 = vmul.f32 0.1, %v792_v23  ;;  %vm818_vm5 = vcmp.gt.f32.partialorder %v782_v26, 0.0  ;;  %vm819_vm6 = vcmp.gt.f32.partialorder %v783_v27, 0.0  ;;  %s4339_s16 = smov 4   ;;  %s4340_s30 = smov 2  }
  0x67   : > { %v801_v15 = vadd.s32 4294967168, %v797_v14  ;;  %vm821_vm7 = vcmp.gt.f32.partialorder %v785_v28, 0.0  ;;  %v848_v35 = vsel %vm824_vm1, %v788_v20, %v836_v29  ;;  %v849_v36 = vsel %vm825_vm2, %v789_v21, %v837_v30  ;;  %v3847_v29 = vld [vmem:[%s5543_s3 + $0x8] sm:$0xff]  ;;  %s4341_s8 = smov 6   ;;  %s5629_s29 = sld [smem:[#allocation54_spill]] }
  0x68   : > { %v851_v37 = vsel %vm827_vm3, %v791_v22, %v839_v31  ;;  %vm822_vm8 = vcmp.gt.f32.partialorder %v786_v32, 0.0  ;;  %v852_v38 = vsel %vm828_vm4, %v792_v23, %v840_v33  ;;  %v860_v39 = vmul.f32 0.0, %v848_v35  ;;  %s3260_s17 = scalar_lea.sflag [#allocation7], %s4549_s27 }
  0x69   : > { %vm807_vm0 = vcmp.lt.s32.totalorder %v801_v15, 64  ;;  %v863_v41 = vmul.f32 0.0, %v851_v37  ;;  %v830_v43 = vmul.f32 0.1, %v782_v26  ;;  %v831_v44 = vmul.f32 0.1, %v783_v27 }
  0x6a   : > { %v4578_v25 = vsel %vm807_vm0, 1.0, %v4329_v24  ;;  %v833_v45 = vmul.f32 0.1, %v785_v28  ;;  %v834_v47 = vmul.f32 0.1, %v786_v32  ;;  %v790_v48 = vunpack.c.l.bf16 %v3845_v34  ;;  %v3846_v37 = vld [vmem:[%s5543_s3] sm:$0xff] }
  0x6b   : > { %v861_v40 = vmul.f32 %v4578_v25, %v849_v36  ;;  %v864_v42 = vmul.f32 %v4578_v25, %v852_v38  ;;  %v793_v49 = vunpack.c.h.bf16 %v3845_v34  ;;  %v842_v51 = vsel %vm818_vm5, %v782_v26, %v830_v43  ;;  %v885_v43 = vld [vmem:[#allocation5 + $0x18] sm:$0xff] }
  0x6c   : > { %v843_v52 = vsel %vm819_vm6, %v783_v27, %v831_v44  ;;  %v845_v53 = vsel %vm821_vm7, %v785_v28, %v833_v45  ;;  %v846_v55 = vsel %vm822_vm8, %v786_v32, %v834_v47  ;;  %v854_v56 = vmul.f32 0.0, %v842_v51  ;;  %v883_v45 = vld [vmem:[#allocation5 + $0x8] sm:$0xff] }
  0x6d   : > { %v870_v46 = vpack.c.bf16 %v861_v40, %v860_v39  ;;  %v872_v50 = vpack.c.bf16 %v864_v42, %v863_v41  ;;  %v855_v57 = vmul.f32 %v4578_v25, %v843_v52  ;;  %v857_v60 = vmul.f32 0.0, %v845_v53  ;;  %v884_v42 = vld [vmem:[#allocation5 + $0x10] sm:$0xff] }
  0x6e   : > { %v858_v61 = vmul.f32 %v4578_v25, %v846_v55  ;;  %vm826_vm9 = vcmp.gt.f32.partialorder %v790_v48, 0.0  ;;  %vm829_vm10 = vcmp.gt.f32.partialorder %v793_v49, 0.0  ;;  %v838_v3 = vmul.f32 0.1, %v790_v48  ;;  %v3848_v52 = vld [vmem:[%s5543_s3 + $0x10] sm:$0xff]  ;;  %v882_v55 = vld [vmem:[#allocation5] sm:$0xff] }
  0x6f   : > { %v914_v54 = vunpack.c.l.b16 %v870_v46  ;;  %v917_v59 = vunpack.c.l.b16 %v872_v50  ;;  %v915_v62 = vunpack.c.h.b16 %v870_v46  ;;  %v866_v63 = vpack.c.bf16 %v855_v57, %v854_v56 }
  0x70   : > { %v918_v0 = vunpack.c.h.b16 %v872_v50  ;;  %v868_v2 = vpack.c.bf16 %v858_v61, %v857_v60  ;;  %v841_v4 = vmul.f32 0.1, %v793_v49  ;;  %v784_v8 = vunpack.c.l.bf16 %v3844_v58 }
  0x71   : > { %v4592_v1 = vpack.c.b16 %v917_v59, %v914_v54  ;;  %v908_v5 = vunpack.c.l.b16 %v866_v63  ;;  %v909_v7 = vunpack.c.h.b16 %v866_v63  ;;  %v850_v11 = vsel %vm826_vm9, %v790_v48, %v838_v3  ;;  %v3851_v3 = vld [vmem:[%s5543_s3 + $0x28] sm:$0xff] }
  0x72   : > { %v4594_v6 = vpack.c.b16 %v918_v0, %v915_v62  ;;  %v911_v9 = vunpack.c.l.b16 %v868_v2  ;;  %v912_v10 = vunpack.c.h.b16 %v868_v2  ;;  %v853_v12 = vsel %vm829_vm10, %v793_v49, %v841_v4  ;;  %v3850_v62 = vld [vmem:[%s5543_s3 + $0x20] sm:$0xff]  ;;  %v3849_v0 = vld [vmem:[%s5543_s3 + $0x18] sm:$0xff] }
  0x73   : > { %1049 = vrot.lane.b32.xlu0 %v4592_v1, %s4330_s13  ;;  %1162 = vrot.lane.b32.xlu2 %v4592_v1, %s4331_s14  ;;  %v862_v13 = vmul.f32 0.0, %v850_v11  ;;  %v865_v14 = vmul.f32 0.0, %v853_v12  ;;  %v787_v15 = vunpack.c.h.bf16 %v3844_v58  ;;  %vm820_vm11 = vcmp.gt.f32.partialorder %v784_v8, 0.0 }
  0x74   : > { %3891 = vmatpush.bf16.msra.mxu2 %v4592_v1  ;;  %3893 = vmatpush.bf16.msra.mxu3 %v4594_v6  ;;  %v4604_v16 = vpack.c.b16 %v911_v9, %v908_v5  ;;  %v4606_v17 = vpack.c.b16 %v912_v10, %v909_v7  ;;  %v832_v18 = vmul.f32 0.1, %v784_v8  ;;  %vm932_vm13 = vcmask 261120  }
  0x75   : > { %964 = vmatpush.bf16.msra.mxu1 %v4594_v6  ;;  %945 = vmatpush.bf16.msra.mxu0 %v4592_v1  ;;  %v871_v19 = vpack.c.bf16 %v862_v13, %v862_v13  ;;  %v873_v20 = vpack.c.bf16 %v865_v14, %v865_v14  ;;  %vm823_vm12 = vcmp.gt.f32.partialorder %v787_v15, 0.0  ;;  %v835_v21 = vmul.f32 0.1, %v787_v15 }
  0x76   : > { %1043 = vrot.lane.b32.xlu1 %v4604_v16, %s4330_s13  ;;  %v844_v22 = vsel %vm820_vm11, %v784_v8, %v832_v18  ;;  %vm1168_vm14 = vcmask 1031168   ;;  %v4332_v41 = vmov 0   ;;  %vm1055_vm15 = vcmask 1039360  }
  0x77   : > { %v916_v23 = vunpack.c.l.b16 %v871_v19  ;;  %v919_v26 = vunpack.c.l.b16 %v873_v20  ;;  %v847_v27 = vsel %vm823_vm12, %v787_v15, %v835_v21  ;;  %v856_v28 = vmul.f32 0.0, %v844_v22  ;;  %4031 = vset.pattern.permute.xlu1 %v4332_v41  ;;  %4030 = vset.pattern.permute.xlu0 %v4332_v41 }
  0x78   : > { %3892 = vmatpush.bf16.msra.mxu2 %v4604_v16  ;;  %3894 = vmatpush.bf16.msra.mxu3 %v4606_v17  ;;  %v859_v30 = vmul.f32 0.0, %v847_v27  ;;  %vm1561_vm12 = vcmask 1014784  }
  0x79   : > { %965 = vmatpush.bf16.msra.mxu1 %v4606_v17  ;;  %946 = vmatpush.bf16.msra.mxu0 %v4604_v16  ;;  %v867_v31 = vpack.c.bf16 %v856_v28, %v856_v28  ;;  %v4621_v32 = vpack.c.b16 %v919_v26, %v916_v23 }
  0x7a   : > { %v869_v33 = vpack.c.bf16 %v859_v30, %v859_v30  ;;  %4032 = vset.pattern.permute.xlu2 %v4332_v41 }
  0x7b   : > { %1051 = vrot.lane.b32.xlu0 %v4594_v6, %s4330_s13  ;;  %1164 = vrot.lane.b32.xlu2 %v4594_v6, %s4331_s14  ;;  %v910_v34 = vunpack.c.l.b16 %v867_v31 }
  0x7c   : > { %3525 = vmatmul.msk.bf16.vlgmr.msra.gmra.mxu2 %vm932_vm13, %v3847_v29  ;;  %3527 = vmatmul.msk.bf16.vlgmr.msra.gmra.mxu3 %vm932_vm13, %v3847_v29  ;;  %v913_v35 = vunpack.c.l.b16 %v869_v33 }
  0x7d   : > { %983 = vmatpush.bf16.msrb.mxu2 %v4621_v32  ;;  %3526 = vmatmul.msk.bf16.vlgmr.msra.gmra.mxu1 %vm932_vm13, %v3846_v37 }
  0x7e   : > { %1045 = vrot.lane.b32.xlu1 %v4606_v17, %s4330_s13  ;;  %v4630_v36 = vpack.c.b16 %v913_v35, %v910_v34  ;;  %3524 = vmatmul.msk.bf16.vlgmr.msra.gmra.mxu0 %vm932_vm13, %v3846_v37 }
  0x81   : > { %984 = vmatpush.bf16.msrb.mxu2 %v4630_v36 }
  0x83   : > { %1166 = vrot.lane.b32.xlu0 %v4621_v32, %s4331_s14  ;;  %1156 = vrot.lane.b32.xlu2 %v4604_v16, %s4331_s14 }
  0x86   : > { %1053 = vrot.lane.b32.xlu1 %v4621_v32, %s4330_s13 }
  0x8b   : > { %1158 = vrot.lane.b32.xlu0 %v4606_v17, %s4331_s14  ;;  %1047 = vrot.lane.b32.xlu2 %v4630_v36, %s4330_s13 }
  0x8c   : > { %3528 = vmatmul.msk.bf16.vlgmr.msrb.gmra.mxu2 %vm932_vm13, %v3846_v37 }
  0x8e   : > { %1160 = vrot.lane.b32.xlu1 %v4630_v36, %s4331_s14 }
  0x93   : > { %1008 = vperm.xlu0 %4030, %v884_v42   ;;  %998 = vperm.xlu2 %4032, %v882_v55  }
  0x96   : > { %1013 = vperm.xlu1 %4031, %v885_v43  }
  0x9b   : > { %1297 = vrot.lane.b32.xlu0 %v4329_v24, %s4330_s13  ;;  %4034 = vrot.lane.b32.xlu2 %v4578_v25, %s4330_s13 }
  0x9c   : > { %3529 = vmatmul.msk.bf16.gmra.mxu2 %vm932_vm13, %v3847_v29 }
  0x9e   : > { %1003 = vperm.xlu1 %4031, %v883_v45  }
  0xcd   : > { %v1163_v38 = vpop.permute.xlu2 %1162 }
  0xd5   : > { %v1165_v39 = vpop.permute.xlu2 %1164 }
  0xd6   : > { %v4653_v40 = vsel %vm1168_vm14, %v1163_v38, %v1165_v39 }
  0xd7   : > { %1191 = vmatpush.bf16.msra.mxu2 %v4653_v40 }
  0xdd   : > { %v1157_v49 = vpop.permute.xlu2 %1156 }
  0xe5   : > { %v1050_v44 = vpop.permute.xlu0 %1049  ;;  %v1048_v58 = vpop.permute.xlu2 %1047 }
  0xe8   : > { %v1044_v46 = vpop.permute.xlu1 %1043 }
  0xed   : > { %v1052_v47 = vpop.permute.xlu0 %1051  ;;  %v4728_v29 = vpop.permute.xlu2 %998 }
  0xee   : > { %v4659_v48 = vsel %vm1055_vm15, %v1050_v44, %v1052_v47 }
  0xef   : > { %1078 = vmatpush.bf16.msrb.mxu3 %v4659_v48 }
  0xf0   : > { %v1046_v50 = vpop.permute.xlu1 %1045 }
  0xf1   : > { %v4663_v51 = vsel %vm1055_vm15, %v1044_v46, %v1046_v50  ;;  %v4679_v60 = vsel %vm1055_vm15, %v1046_v50, %v1048_v58 }
  0xf3   : > { %1079 = vmatpush.bf16.msrb.mxu3 %v4663_v51 }
  0xf5   : > { %v1167_v53 = vpop.permute.xlu0 %1166 }
  0xf6   : > { %v4670_v54 = vsel %vm1168_vm14, %v1165_v39, %v1167_v53  ;;  %3542 = vmatmul.msk.bf16.vlgmr.msrb.gmra.mxu3 %vm932_vm13, %v3848_v52 }
  0xf7   : > { %1210 = vmatpush.bf16.msra.mxu3 %v4670_v54 }
  0xf8   : > { %v1054_v56 = vpop.permute.xlu1 %1053 }
  0xf9   : > { %1116 = vmatpush.bf16.msrb.mxu1 %v1054_v56  ;;  %v4675_v57 = vsel %vm1055_vm15, %v1052_v47, %v1054_v56 }
  0xfa   : > { %1097 = vmatpush.bf16.msrb.mxu0 %v4675_v57  ;;  %v967_v18 = vpop.f32.mrf.mxu1 }
  0xfb   : > { %v948_v9 = vpop.f32.mrf.mxu0  ;;  %v1017_v35 = vadd.f32 %v4728_v29, %v967_v18 }
  0xfc   : > { %v1016_v33 = vadd.f32 %v4728_v29, %v948_v9 }
  0xfd   : > { %v1159_v59 = vpop.permute.xlu0 %1158  ;;  %1117 = vmatpush.bf16.msrb.mxu1 %v1048_v58 }
  0xfe   : > { %v4682_v61 = vsel %vm1168_vm14, %v1157_v49, %v1159_v59  ;;  %1098 = vmatpush.bf16.msrb.mxu0 %v4679_v60  ;;  %v4035_v49 = vpop.permute.xlu2 %4034 }
  0xff   : > { %1192 = vmatpush.bf16.msra.mxu2 %v4682_v61  ;;  %v953_v4 = vpop.f32.mrf.mxu2  ;;  %v4716_v8 = vpop.f32.mrf.mxu3 }
 0x100   : > { %3546 = vmatmul.msk.bf16.vlgmr.msrb.gmra.mxu1 %vm932_vm13, %v3848_v52  ;;  %v1161_v63 = vpop.permute.xlu1 %1160 }
 0x101   : > { %3544 = vmatmul.msk.bf16.vlgmr.msrb.gmra.mxu0 %vm932_vm13, %v3848_v52  ;;  %v4696_v2 = vsel %vm1168_vm14, %v1159_v59, %v1161_v63  ;;  %v4037_v59 = vunpack.i.h.bf16 %v4035_v49 }
 0x102   : > { %1229 = vmatpush.bf16.msra.mxu0 %v1167_v53  ;;  %3560 = vmatmul.msk.bf16.vlgmr.msra.gmra.mxu2 %vm932_vm13, %v3850_v62  ;;  %v969_v23 = vpop.f32.mrf.mxu1 }
 0x103   : > { %1211 = vmatpush.bf16.msra.mxu3 %v4696_v2  ;;  %v950_v12 = vpop.f32.mrf.mxu0 }
 0x105   : > { %v1009_v31 = vpop.permute.xlu0 %1008 }
 0x106   : > { %1230 = vmatpush.bf16.msra.mxu0 %v1161_v63  ;;  %3543 = vmatmul.msk.bf16.gmra.mxu3 %vm932_vm13, %v3849_v0  ;;  %v1022_v63 = vadd.f32 %v1009_v31, %v953_v4 }
 0x107   : > { %v4712_v5 = vpop.f32.mrf.mxu2  ;;  %v4720_v11 = vpop.f32.mrf.mxu3 }
 0x108   : > { %v4726_v27 = vpop.permute.xlu1 %1013 }
 0x10d   : > { %v4740_v55 = vpop.permute.xlu0 %1297 }
 0x10f   : > { %v4714_v7 = vpop.f32.mrf.mxu2 }
 0x110   : > { %3547 = vmatmul.msk.bf16.gmra.mxu1 %vm932_vm13, %v3849_v0  ;;  %v4734_v37 = vpop.permute.xlu1 %1003 }
 0x111   : > { %3545 = vmatmul.msk.bf16.gmra.mxu0 %vm932_vm13, %v3849_v0  ;;  %v1019_v39 = vadd.f32 %v4734_v37, %v950_v12  ;;  %v1020_v50 = vadd.f32 %v4734_v37, %v969_v23 }
 0x112   : > { %3561 = vmatmul.msk.bf16.gmra.mxu2 %vm932_vm13, %v3851_v3 }
 0x116   : > { %3562 = vmatmul.msk.bf16.vlgmr.msra.gmra.mxu3 %vm932_vm13, %v3850_v62 }
 0x117   : > { %v4718_v10 = vpop.f32.mrf.mxu2 }
 0x11f   : > { %v4722_v13 = vpop.f32.mrf.mxu2 }
 0x121   : > { %3564 = vmatmul.msk.bf16.vlgmr.msra.gmra.mxu0 %vm932_vm13, %v3850_v62  ;;  %v4036_v62 = vunpack.i.l.bf16 %v4035_v49 }
 0x123   : > { %v4751_v23 = vsel %vm1055_vm15, %v4036_v62, %v4037_v59 }
 0x126   : > { %3563 = vmatmul.msk.bf16.gmra.mxu3 %vm932_vm13, %v3851_v3 }
 0x127   : > { %v4724_v19 = vpop.f32.mrf.mxu2 }
 0x131   : > { %3565 = vmatmul.msk.bf16.gmra.mxu0 %vm932_vm13, %v3851_v3 }
 0x179   : > { %v1081_v14 = vpop.f32.mrf.mxu3 }
 0x17a   : > { %v1129_v42 = vadd.f32 %v1081_v14, %v1016_v33 }
 0x17d   : > { %v4731_v34 = vpop.f32.mrf.mxu1 }
 0x17e   : > { %v1100_v15 = vpop.f32.mrf.mxu0 }
 0x17f   : > { %v1130_v43 = vadd.f32 %v1100_v15, %v1017_v35  ;;  %v4748_v15 = vsel %vm1055_vm15, %v4037_v59, %v4740_v55 }
 0x181   : > { %v1083_v20 = vpop.f32.mrf.mxu3 }
 0x182   : > { %v1132_v45 = vadd.f32 %v1083_v20, %v1019_v39 }
 0x185   : > { %v1194_v26 = vpop.f32.mrf.mxu2  ;;  %v4742_v56 = vpop.f32.mrf.mxu1 }
 0x186   : > { %v1102_v21 = vpop.f32.mrf.mxu0  ;;  %v1242_v46 = vadd.f32 %v1194_v26, %v1129_v42  ;;  %v1023_v42 = vadd.f32 %v1009_v31, %v4716_v8  ;;  %v1024_v8 = vadd.f32 %v1009_v31, %v4722_v13  ;;  %v1018_v13 = vadd.f32 %v4728_v29, %v4714_v7 }
 0x187   : > { %v1133_v9 = vadd.f32 %v1102_v21, %v1020_v50 }
 0x188   : > { %v1266_v58 = vmul.f32 0.1, %v1242_v46  ;;  %vm1254_vm1 = vcmp.gt.f32.partialorder %v1242_v46, 0.0 }
 0x189   : > { %v1086_v22 = vpop.f32.mrf.mxu3 }
 0x18a   : > { %v1278_v20 = vsel %vm1254_vm1, %v1242_v46, %v1266_v58  ;;  %v1135_v26 = vadd.f32 %v1086_v22, %v1022_v63  ;;  %v1025_v22 = vadd.f32 %v4726_v27, %v4712_v5  ;;  %vm1912_vm1 = vcmask 998400  }
 0x18b   : > { %v1305_v39 = vmul.f32 %v4751_v23, %v1278_v20 }
 0x18d   : > { %v1196_v38 = vpop.f32.mrf.mxu2  ;;  %v1124_v49 = vpop.f32.mrf.mxu1 }
 0x18e   : > { %v1105_v28 = vpop.f32.mrf.mxu0  ;;  %v1245_v52 = vadd.f32 %v1196_v38, %v1132_v45  ;;  %v1137_v20 = vadd.f32 %v1124_v49, %v1024_v8 }
 0x18f   : > { %v1136_v50 = vadd.f32 %v1105_v28, %v1023_v42  ;;  %v1026_v28 = vadd.f32 %v4726_v27, %v4720_v11 }
 0x190   : > { %v1269_v12 = vmul.f32 0.1, %v1245_v52  ;;  %vm1257_vm2 = vcmp.gt.f32.partialorder %v1245_v52, 0.0 }
 0x191   : > { %v1088_v30 = vpop.f32.mrf.mxu3 }
 0x192   : > { %v1281_v35 = vsel %vm1257_vm2, %v1245_v52, %v1269_v12  ;;  %v1138_v62 = vadd.f32 %v1088_v30, %v1025_v22 }
 0x195   : > { %v1199_v0 = vpop.f32.mrf.mxu2 }
 0x196   : > { %v4737_v41 = vpop.f32.mrf.mxu0  ;;  %v1248_v38 = vadd.f32 %v1199_v0, %v1135_v26 }
 0x198   : > { %v1272_v52 = vmul.f32 0.1, %v1248_v38  ;;  %vm1260_vm4 = vcmp.gt.f32.partialorder %v1248_v38, 0.0 }
 0x199   : > { %v1213_v44 = vpop.f32.mrf.mxu3 }
 0x19a   : > { %v1243_v47 = vadd.f32 %v1213_v44, %v1130_v43  ;;  %v1308_v44 = vmul.f32 %v4751_v23, %v1281_v35  ;;  %v1284_v12 = vsel %vm1260_vm4, %v1248_v38, %v1272_v52  ;;  %v1139_v35 = vadd.f32 %v4737_v41, %v1026_v28 }
 0x19b   : > { %v1311_v30 = vmul.f32 %v4751_v23, %v1284_v12 }
 0x19c   : > { %v1267_v53 = vmul.f32 0.1, %v1243_v47  ;;  %vm1255_vm0 = vcmp.gt.f32.partialorder %v1243_v47, 0.0 }
 0x19e   : > { %v4744_v3 = vpop.f32.mrf.mxu0  ;;  %v1279_v14 = vsel %vm1255_vm0, %v1243_v47, %v1267_v53  ;;  %v1201_v53 = vpop.f32.mrf.mxu2  ;;  %vm1799_vm0 = vcmask 1022976  }
 0x19f   : > { %v1306_v4 = vmul.f32 %v4748_v15, %v1279_v14  ;;  %v1251_v14 = vadd.f32 %v1201_v53, %v1138_v62 }
 0x1a1   : > { %v1215_v18 = vpop.f32.mrf.mxu3  ;;  %v4758_v47 = vpack.c.bf16 %v1306_v4, %v1305_v39  ;;  %v1021_v4 = vadd.f32 %v4734_v37, %v4718_v10  ;;  %v1275_v38 = vmul.f32 0.1, %v1251_v14  ;;  %vm1263_vm6 = vcmp.gt.f32.partialorder %v1251_v14, 0.0 }
 0x1a2   : > { %v1246_v33 = vadd.f32 %v1215_v18, %v1133_v9 }
 0x1a3   : > { %v1349_v0 = vunpack.c.l.b16 %v4758_v47  ;;  %v1134_v7 = vadd.f32 %v4742_v56, %v1021_v4  ;;  %v1287_v22 = vsel %vm1263_vm6, %v1251_v14, %v1275_v38 }
 0x1a4   : > { %vm1258_vm3 = vcmp.gt.f32.partialorder %v1246_v33, 0.0  ;;  %v1270_v21 = vmul.f32 0.1, %v1246_v33  ;;  %v1314_v56 = vmul.f32 %v4751_v23, %v1287_v22 }
 0x1a6   : > { %v1282_v43 = vsel %vm1258_vm3, %v1246_v33, %v1270_v21  ;;  %v1234_v46 = vpop.f32.mrf.mxu0 }
 0x1a7   : > { %v1309_v45 = vmul.f32 %v4748_v15, %v1282_v43  ;;  %v1131_v43 = vadd.f32 %v4731_v34, %v1018_v13  ;;  %v1247_v10 = vadd.f32 %v1234_v46, %v1134_v7 }
 0x1a9   : > { %v1218_v58 = vpop.f32.mrf.mxu3  ;;  %v4762_v59 = vpack.c.bf16 %v1309_v45, %v1308_v44  ;;  %v1027_v44 = vadd.f32 %v4726_v27, %v4724_v19  ;;  %v1126_v45 = vpop.f32.mrf.mxu1  ;;  %v1244_v49 = vadd.f32 %v4744_v3, %v1131_v43  ;;  %v1271_v34 = vmul.f32 0.1, %v1247_v10  ;;  %v1660_v43 = vld [vmem:[#allocation8 + $0x8] sm:$0xff] }
 0x1aa   : > { %v1249_v63 = vadd.f32 %v1218_v58, %v1136_v50  ;;  %vm1259_vm9 = vcmp.gt.f32.partialorder %v1247_v10, 0.0 }
 0x1ab   : > { %v1351_v9 = vunpack.c.l.b16 %v4762_v59  ;;  %v1140_v41 = vadd.f32 %v1126_v45, %v1027_v44  ;;  %vm1256_vm10 = vcmp.gt.f32.partialorder %v1244_v49, 0.0  ;;  %v1268_v46 = vmul.f32 0.1, %v1244_v49  ;;  %v3853_v44 = vld [vmem:[%s5543_s3 + $0x38] sm:$0xff] }
 0x1ac   : > { %vm1261_vm5 = vcmp.gt.f32.partialorder %v1249_v63, 0.0  ;;  %v1273_v5 = vmul.f32 0.1, %v1249_v63  ;;  %v1283_v12 = vsel %vm1259_vm9, %v1247_v10, %v1271_v34  ;;  %v1352_v23 = vunpack.c.h.b16 %v4762_v59 }
 0x1ad   : > { %v4767_v18 = vpack.c.b16 %v1351_v9, %v1349_v0 }
 0x1ae   : > { %v1285_v26 = vsel %vm1261_vm5, %v1249_v63, %v1273_v5  ;;  %v1237_v33 = vpop.f32.mrf.mxu0 }
 0x1af   : > { %v1312_v31 = vmul.f32 %v4748_v15, %v1285_v26  ;;  %1462 = vrot.lane.b32.xlu0 %v4767_v18, %s4331_s14  ;;  %v1250_v11 = vadd.f32 %v1237_v33, %v1137_v20  ;;  %v1280_v26 = vsel %vm1256_vm10, %v1244_v49, %v1268_v46 }
 0x1b1   : > { %v1220_v21 = vpop.f32.mrf.mxu3  ;;  %v1321_v39 = vpack.c.bf16 %v1312_v31, %v1311_v30  ;;  %v1274_v29 = vmul.f32 0.1, %v1250_v11  ;;  %vm1262_vm7 = vcmp.gt.f32.partialorder %v1250_v11, 0.0  ;;  %v1350_v30 = vunpack.c.h.b16 %v4758_v47 }
 0x1b2   : > { %v1252_v42 = vadd.f32 %v1220_v21, %v1139_v35  ;;  %v1310_v31 = vmul.f32 %v4740_v55, %v1283_v12  ;;  %v1307_v35 = vmul.f32 %v4740_v55, %v1280_v26  ;;  %v3855_v12 = vld [vmem:[%s5543_s3 + $0x48] sm:$0xff] }
 0x1b3   : > { %v1286_v50 = vsel %vm1262_vm7, %v1250_v11, %v1274_v29  ;;  %v1354_v63 = vunpack.c.h.b16 %v1321_v39  ;;  %v1353_v3 = vunpack.c.l.b16 %v1321_v39  ;;  %v1358_v59 = vpack.c.b16 %v1352_v23, %v1350_v30  ;;  %v1662_v29 = vld [vmem:[#allocation8 + $0x18] sm:$0xff] }
 0x1b4   : > { %vm1264_vm8 = vcmp.gt.f32.partialorder %v1252_v42, 0.0  ;;  %v1276_v37 = vmul.f32 0.1, %v1252_v42  ;;  %v1313_v19 = vmul.f32 %v4740_v55, %v1286_v50  ;;  %v1320_v11 = vpack.c.bf16 %v1310_v31, %v1310_v31 }
 0x1b5   : > { %v1318_v21 = vpack.c.bf16 %v1307_v35, %v1307_v35 }
 0x1b6   : > { %v1288_v52 = vsel %vm1264_vm8, %v1252_v42, %v1276_v37  ;;  %v1239_v58 = vpop.f32.mrf.mxu0  ;;  %v1322_v20 = vpack.c.bf16 %v1313_v19, %v1313_v19  ;;  %v1457_v47 = vunpack.c.l.b16 %v1320_v11  ;;  %v1661_v42 = vld [vmem:[#allocation8 + $0x10] sm:$0xff] }
 0x1b7   : > { %v1315_v53 = vmul.f32 %v4748_v15, %v1288_v52  ;;  %v1253_v8 = vadd.f32 %v1239_v58, %v1140_v41  ;;  %v1456_v39 = vunpack.c.l.b16 %v1318_v21  ;;  %v3854_v58 = vld [vmem:[%s5543_s3 + $0x40] sm:$0xff]  ;;  %v3856_v19 = vld [vmem:[%s5543_s3 + $0x50] sm:$0xff] }
 0x1b8   : > { %v1458_v33 = vunpack.c.l.b16 %v1322_v20 }
 0x1b9   : > { %v1323_v27 = vpack.c.bf16 %v1315_v53, %v1314_v56  ;;  %vm1265_vm11 = vcmp.gt.f32.partialorder %v1253_v8, 0.0  ;;  %v1277_v62 = vmul.f32 0.1, %v1253_v8  ;;  %v1460_v7 = vpack.c.b16 %v1457_v47, %v1456_v39 }
 0x1bb   : > { %v1356_v0 = vunpack.c.h.b16 %v1323_v27  ;;  %v1355_v9 = vunpack.c.l.b16 %v1323_v27  ;;  %v1289_v14 = vsel %vm1265_vm11, %v1253_v8, %v1277_v62 }
 0x1bc   : > { %v1316_v28 = vmul.f32 %v4740_v55, %v1289_v14  ;;  %v3852_v55 = vld [vmem:[%s5543_s3 + $0x30] sm:$0xff] }
 0x1bd   : > { %v1360_v15 = vpack.c.b16 %v1356_v0, %v1354_v63  ;;  %v1359_v5 = vpack.c.b16 %v1355_v9, %v1353_v3 }
 0x1be   : > { %v1324_v13 = vpack.c.bf16 %v1316_v28, %v1316_v28  ;;  %v3857_v28 = vld [vmem:[%s5543_s3 + $0x58] sm:$0xff] }
 0x1bf   : > { %1470 = vrot.lane.b32.xlu2 %v1360_v15, %s4331_s14  ;;  %1396 = vmatpush.bf16.msrb.mxu2 %v1360_v15 }
 0x1c0   : > { %1468 = vrot.lane.b32.xlu1 %v1359_v5, %s4331_s14  ;;  %1377 = vmatpush.bf16.msra.mxu1 %v1359_v5  ;;  %v1459_v4 = vunpack.c.l.b16 %v1324_v13 }
 0x1c2   : > { %v1461_v38 = vpack.c.b16 %v1459_v4, %v1458_v33 }
 0x1c3   : > { %1397 = vmatpush.bf16.msrb.mxu2 %v1358_v59 }
 0x1c4   : > { %1378 = vmatpush.bf16.msra.mxu1 %v4767_v18  ;;  %1559 = vrot.lane.b32.xlu0 %v1461_v38, %s4333_s7 }
 0x1c6   : > { %3580 = vmatmul.msk.bf16.vlgmr.msrb.gmra.mxu2 %vm932_vm13, %v3852_v55 }
 0x1c7   : > { %1551 = vrot.lane.b32.xlu2 %v1358_v59, %s4333_s7  ;;  %3578 = vmatmul.msk.bf16.vlgmr.msra.gmra.mxu1 %vm932_vm13, %v3852_v55 }
 0x1c8   : > { %1464 = vrot.lane.b32.xlu1 %v1358_v59, %s4331_s14 }
 0x1cc   : > { %1553 = vrot.lane.b32.xlu0 %v1460_v7, %s4333_s7 }
 0x1cf   : > { %1557 = vrot.lane.b32.xlu2 %v1360_v15, %s4333_s7 }
 0x1d0   : > { %1472 = vrot.lane.b32.xlu1 %v1461_v38, %s4331_s14 }
 0x1d4   : > { %1549 = vrot.lane.b32.xlu0 %v4767_v18, %s4333_s7  ;;  %v1659_v18 = vld [vmem:[#allocation8] sm:$0xff] }
 0x1d6   : > { %3581 = vmatmul.msk.bf16.gmra.mxu2 %vm932_vm13, %v3853_v44 }
 0x1d7   : > { %1466 = vrot.lane.b32.xlu2 %v1460_v7, %s4331_s14  ;;  %3579 = vmatmul.msk.bf16.gmra.mxu1 %vm932_vm13, %v3853_v44 }
 0x1d8   : > { %1555 = vrot.lane.b32.xlu1 %v1359_v5, %s4333_s7 }
 0x1dc   : > { %1797 = vrot.lane.b32.xlu0 %v4621_v32, %s4334_s12 }
 0x1df   : > { %1795 = vrot.lane.b32.xlu2 %v4594_v6, %s4334_s12 }
 0x1e0   : > { %1793 = vrot.lane.b32.xlu1 %v4592_v1, %s4334_s12 }
 0x1e4   : > { %1791 = vrot.lane.b32.xlu0 %v4630_v36, %s4334_s12 }
 0x1e7   : > { %1789 = vrot.lane.b32.xlu2 %v4606_v17, %s4334_s12 }
 0x1e8   : > { %1787 = vrot.lane.b32.xlu1 %v4604_v16, %s4334_s12 }
 0x1ec   : > { %1902 = vrot.lane.b32.xlu0 %v4606_v17, %s4335_s11 }
 0x1ef   : > { %1910 = vrot.lane.b32.xlu2 %v4621_v32, %s4335_s11 }
 0x1f0   : > { %1908 = vrot.lane.b32.xlu1 %v4594_v6, %s4335_s11 }
 0x1f4   : > { %1900 = vrot.lane.b32.xlu0 %v4604_v16, %s4335_s11 }
 0x1f7   : > { %1906 = vrot.lane.b32.xlu2 %v4592_v1, %s4335_s11 }
 0x1f8   : > { %1904 = vrot.lane.b32.xlu1 %v4630_v36, %s4335_s11  ;;  %s5585_s11 = sld [smem:[#allocation50_spill]] }
 0x1fc   : > { %1742 = vperm.xlu0 %4030, %v1659_v18  }
 0x1fe   : > { %v3858_v59 = vld [vmem:[%s5585_s11] sm:$0xff]  ;;  %v3860_v35 = vld [vmem:[%s5585_s11 + $0x10] sm:$0xff]  ;;  %v3859_v55 = vld [vmem:[%s5585_s11 + $0x8] sm:$0xff] }
 0x1ff   : > { %1757 = vperm.xlu2 %4032, %v1662_v29   ;;  %v3862_v44 = vld [vmem:[%s5585_s11 + $0x20] sm:$0xff] }
 0x200   : > { %1752 = vperm.xlu1 %4031, %v1661_v42  }
 0x204   : > { %2038 = vrot.lane.b32.xlu0 %v4329_v24, %s4334_s12 }
 0x207   : > { %4039 = vrot.lane.b32.xlu2 %v4578_v25, %s4334_s12  ;;  %s4336_s12 = smov 119  }
 0x208   : > { %1747 = vperm.xlu1 %4031, %v1660_v43   ;;  %v3861_v43 = vld [vmem:[%s5585_s11 + $0x18] sm:$0xff] }
 0x219   : > { %v1471_v45 = vpop.permute.xlu2 %1470 }
 0x221   : > { %v1552_v22 = vpop.permute.xlu2 %1551  ;;  %v1463_v10 = vpop.permute.xlu0 %1462 }
 0x229   : > { %v1558_v37 = vpop.permute.xlu2 %1557 }
 0x231   : > { %v1467_v52 = vpop.permute.xlu2 %1466 }
 0x232   : > { %v1469_v41 = vpop.permute.xlu1 %1468 }
 0x233   : > { %v1476_v49 = vsel %vm1168_vm14, %v1469_v41, %v1471_v45 }
 0x234   : > { %1494 = vmatpush.bf16.msrb.mxu3 %v1476_v49 }
 0x236   : > { %v1560_v50 = vpop.permute.xlu0 %1559 }
 0x237   : > { %v1565_v24 = vsel %vm1561_vm12, %v1558_v37, %v1560_v50 }
 0x238   : > { %1601 = vmatpush.bf16.msra.mxu2 %v1565_v24 }
 0x239   : > { %v1796_v62 = vpop.permute.xlu2 %1795 }
 0x23a   : > { %v1465_v56 = vpop.permute.xlu1 %1464 }
 0x23b   : > { %v1474_v53 = vsel %vm1168_vm14, %v1463_v10, %v1465_v56  ;;  %v1475_v0 = vsel %vm1168_vm14, %v1465_v56, %v1467_v52 }
 0x23c   : > { %1495 = vmatpush.bf16.msrb.mxu3 %v1474_v53 }
 0x23e   : > { %v1554_v34 = vpop.permute.xlu0 %1553 }
 0x23f   : > { %3594 = vmatmul.msk.bf16.vlgmr.msrb.gmra.mxu3 %vm932_vm13, %v3854_v58  ;;  %v1563_v8 = vsel %vm1561_vm12, %v1552_v22, %v1554_v34 }
 0x240   : > { %1689 = vmatpush.bf16.msra.mxu3 %v4592_v1  ;;  %1602 = vmatpush.bf16.msra.mxu2 %v1563_v8 }
 0x241   : > { %v1790_v14 = vpop.permute.xlu2 %1789 }
 0x242   : > { %v1473_v27 = vpop.permute.xlu1 %1472 }
 0x243   : > { %v1477_v46 = vsel %vm1168_vm14, %v1471_v45, %v1473_v27  ;;  %3612 = vmatmul.msk.bf16.vlgmr.msra.gmra.mxu2 %vm932_vm13, %v3856_v19  ;;  %v3863_v45 = vld [vmem:[%s5585_s11 + $0x28] sm:$0xff] }
 0x244   : > { %1690 = vmatpush.bf16.msra.mxu3 %v4604_v16  ;;  %1513 = vmatpush.bf16.msrb.mxu0 %v1477_v46  ;;  %v4941_v25 = vpop.f32.mrf.mxu1 }
 0x246   : > { %v1550_v63 = vpop.permute.xlu0 %1549 }
 0x247   : > { %v1562_v15 = vsel %vm1561_vm12, %v1550_v63, %v1552_v22 }
 0x248   : > { %1514 = vmatpush.bf16.msrb.mxu0 %v1475_v0 }
 0x249   : > { %v1911_v30 = vpop.permute.xlu2 %1910  ;;  %v4938_v22 = vpop.f32.mrf.mxu2 }
 0x24a   : > { %v1556_v3 = vpop.permute.xlu1 %1555 }
 0x24b   : > { %v1564_v9 = vsel %vm1561_vm12, %v1556_v3, %v1558_v37  ;;  %3596 = vmatmul.msk.bf16.vlgmr.msrb.gmra.mxu0 %vm932_vm13, %v3854_v58 }
 0x24c   : > { %1708 = vmatpush.bf16.msra.mxu0 %v4594_v6  ;;  %1582 = vmatpush.bf16.msrb.mxu1 %v1564_v9  ;;  %v4946_v37 = vpop.f32.mrf.mxu1 }
 0x24e   : > { %v1798_v23 = vpop.permute.xlu0 %1797 }
 0x24f   : > { %3595 = vmatmul.msk.bf16.gmra.mxu3 %vm932_vm13, %v3855_v12  ;;  %v4862_v5 = vsel %vm1799_vm0, %v1796_v62, %v1798_v23 }
 0x250   : > { %1709 = vmatpush.bf16.msra.mxu0 %v4606_v17  ;;  %1583 = vmatpush.bf16.msrb.mxu1 %v1562_v15 }
 0x251   : > { %1841 = vmatpush.bf16.msrb.mxu3 %v4862_v5  ;;  %v1907_v38 = vpop.permute.xlu2 %1906  ;;  %v4943_v10 = vpop.f32.mrf.mxu2 }
 0x252   : > { %v1794_v20 = vpop.permute.xlu1 %1793  ;;  %5590 = vst [vmem:[#allocation32_spill] sm:$0xff] %v4943_v10 }
 0x253   : > { %v4870_v26 = vsel %vm1799_vm0, %v1794_v20, %v1796_v62  ;;  %3610 = vmatmul.msk.bf16.vlgmr.msrb.gmra.mxu1 %vm932_vm13, %v3856_v19  ;;  %3613 = vmatmul.msk.bf16.gmra.mxu2 %vm932_vm13, %v3857_v28 }
 0x254   : > { %1860 = vmatpush.bf16.msrb.mxu0 %v1798_v23  ;;  %1727 = vmatpush.bf16.msra.mxu1 %v4621_v32  ;;  %v4950_v49 = vpop.f32.mrf.mxu1 }
 0x255   : > { %1822 = vmatpush.bf16.msrb.mxu2 %v4870_v26  ;;  %5592 = vst [vmem:[#allocation34_spill] sm:$0xff] %v4950_v49 }
 0x256   : > { %v1792_v13 = vpop.permute.xlu0 %1791 }
 0x257   : > { %v4877_v31 = vsel %vm1799_vm0, %v1790_v14, %v1792_v13 }
 0x258   : > { %1728 = vmatpush.bf16.msra.mxu1 %v4630_v36  ;;  %1861 = vmatpush.bf16.msrb.mxu0 %v1792_v13 }
 0x259   : > { %1842 = vmatpush.bf16.msrb.mxu3 %v4877_v31  ;;  %v4948_v41 = vpop.f32.mrf.mxu2 }
 0x25a   : > { %v1788_v33 = vpop.permute.xlu1 %1787  ;;  %5591 = vst [vmem:[#allocation33_spill] sm:$0xff] %v4948_v41 }
 0x25b   : > { %3597 = vmatmul.msk.bf16.gmra.mxu0 %vm932_vm13, %v3855_v12  ;;  %v4882_v4 = vsel %vm1799_vm0, %v1788_v33, %v1790_v14 }
 0x25c   : > { %1823 = vmatpush.bf16.msrb.mxu2 %v4882_v4  ;;  %v4956_v52 = vpop.f32.mrf.mxu1 }
 0x25d   : > { %5594 = vst [vmem:[#allocation36_spill] sm:$0xff] %v4956_v52 }
 0x25e   : > { %v1903_v39 = vpop.permute.xlu0 %1902 }
 0x25f   : > { %3622 = vmatmul.msk.bf16.vlgmr.msra.gmra.mxu3 %vm932_vm13, %v3858_v59 }
 0x260   : > { %1973 = vmatpush.bf16.msra.mxu3 %v1911_v30 }
 0x261   : > { %v4952_v50 = vpop.f32.mrf.mxu2 }
 0x262   : > { %v1909_v11 = vpop.permute.xlu1 %1908  ;;  %5593 = vst [vmem:[#allocation35_spill] sm:$0xff] %v4952_v50 }
 0x263   : > { %v4893_v21 = vsel %vm1912_vm1, %v1907_v38, %v1909_v11  ;;  %v4896_v47 = vsel %vm1912_vm1, %v1909_v11, %v1911_v30  ;;  %3611 = vmatmul.msk.bf16.gmra.mxu1 %vm932_vm13, %v3857_v28  ;;  %3640 = vmatmul.msk.bf16.vlgmr.msrb.gmra.mxu2 %vm932_vm13, %v3860_v35 }
 0x264   : > { %5586 = vst [vmem:[#allocation28_spill] sm:$0xff] %v4893_v21  ;;  %1935 = vmatpush.bf16.msrb.mxu1 %v4893_v21  ;;  %1954 = vmatpush.bf16.msra.mxu2 %v4896_v47 }
 0x265   : > { %5587 = vst [vmem:[#allocation29_spill] sm:$0xff] %v4896_v47 }
 0x266   : > { %v1901_v29 = vpop.permute.xlu0 %1900 }
 0x267   : > { %v4912_v42 = vsel %vm1912_vm1, %v1901_v29, %v1903_v39 }
 0x268   : > { %5589 = vst [vmem:[#allocation31_spill] sm:$0xff] %v4912_v42  ;;  %1936 = vmatpush.bf16.msrb.mxu1 %v4912_v42 }
 0x26a   : > { %v1905_v7 = vpop.permute.xlu1 %1904 }
 0x26b   : > { %3624 = vmatmul.msk.bf16.vlgmr.msra.gmra.mxu0 %vm932_vm13, %v3858_v59  ;;  %v4907_v18 = vsel %vm1912_vm1, %v1903_v39, %v1905_v7  ;;  %1974 = vmatpush.bf16.msra.mxu3 %v1905_v7 }
 0x26c   : > { %5588 = vst [vmem:[#allocation30_spill] sm:$0xff] %v4907_v18  ;;  %1955 = vmatpush.bf16.msra.mxu2 %v4907_v18  ;;  %v5004_v18 = vpop.permute.xlu2 %1757 }
 0x26e   : > { %v1743_v47 = vpop.permute.xlu0 %1742 }
 0x26f   : > { %3623 = vmatmul.msk.bf16.gmra.mxu3 %vm932_vm13, %v3859_v55 }
 0x273   : > { %3626 = vmatmul.msk.bf16.vlgmr.msra.gmra.mxu1 %vm932_vm13, %v3858_v59  ;;  %3641 = vmatmul.msk.bf16.gmra.mxu2 %vm932_vm13, %v3861_v43 }
 0x274   : > { %v4040_v21 = vpop.permute.xlu2 %4039 }
 0x275   : > { %v4041_v52 = vunpack.i.l.bf16 %v4040_v21 }
 0x27b   : > { %3625 = vmatmul.msk.bf16.gmra.mxu0 %vm932_vm13, %v3859_v55 }
 0x27f   : > { %3642 = vmatmul.msk.bf16.vlgmr.msrb.gmra.mxu3 %vm932_vm13, %v3860_v35 }
 0x283   : > { %3627 = vmatmul.msk.bf16.gmra.mxu1 %vm932_vm13, %v3859_v55  ;;  %3660 = vmatmul.msk.bf16.vlgmr.msra.gmra.mxu2 %vm932_vm13, %v3862_v44  ;;  %v5000_v55 = vpop.permute.xlu1 %1752 }
 0x28b   : > { %3644 = vmatmul.msk.bf16.vlgmr.msrb.gmra.mxu0 %vm932_vm13, %v3860_v35 }
 0x28f   : > { %3643 = vmatmul.msk.bf16.gmra.mxu3 %vm932_vm13, %v3861_v43 }
 0x293   : > { %3658 = vmatmul.msk.bf16.vlgmr.msrb.gmra.mxu1 %vm932_vm13, %v3862_v44  ;;  %3661 = vmatmul.msk.bf16.gmra.mxu2 %vm932_vm13, %v3863_v45 }
 0x29b   : > { %3645 = vmatmul.msk.bf16.gmra.mxu0 %vm932_vm13, %v3861_v43 }
 0x29f   : > { %3662 = vmatmul.msk.bf16.vlgmr.msra.gmra.mxu3 %vm932_vm13, %v3862_v44 }
 0x2a3   : > { %3659 = vmatmul.msk.bf16.gmra.mxu1 %vm932_vm13, %v3863_v45 }
 0x2af   : > { %3663 = vmatmul.msk.bf16.gmra.mxu3 %vm932_vm13, %v3863_v45 }
 0x2c2   : > { %v4954_v24 = vpop.f32.mrf.mxu3 }
 0x2c6   : > { %v4958_v56 = vpop.f32.mrf.mxu2 }
 0x2c7   : > { %5595 = vst [vmem:[#allocation37_spill] sm:$0xff] %v4958_v56 }
 0x2c8   : > { %v4960_v53 = vpop.f32.mrf.mxu0 }
 0x2ca   : > { %v4962_v58 = vpop.f32.mrf.mxu3 }
 0x2ce   : > { %v4964_v34 = vpop.f32.mrf.mxu2 }
 0x2cf   : > { %5596 = vst [vmem:[#allocation38_spill] sm:$0xff] %v4964_v34 }
 0x2d0   : > { %v4966_v8 = vpop.f32.mrf.mxu1  ;;  %v4968_v19 = vpop.f32.mrf.mxu0 }
 0x2d1   : > { %5597 = vst [vmem:[#allocation39_spill] sm:$0xff] %v4966_v8 }
 0x2d2   : > { %5598 = vst [vmem:[#allocation40_spill] sm:$0xff] %v4968_v19  ;;  %v4970_v27 = vpop.f32.mrf.mxu3 }
 0x2d3   : > { %5599 = vst [vmem:[#allocation41_spill] sm:$0xff] %v4970_v27 }
 0x2d6   : > { %v4972_v46 = vpop.f32.mrf.mxu2 }
 0x2d7   : > { %5600 = vst [vmem:[#allocation42_spill] sm:$0xff] %v4972_v46  ;;  %v5006_v46 = vpop.permute.xlu1 %1747 }
 0x2d8   : > { %v4974_v62 = vpop.f32.mrf.mxu1  ;;  %v4978_v0 = vpop.f32.mrf.mxu0 }
 0x2d9   : > { %5602 = vst [vmem:[#allocation44_spill] sm:$0xff] %v4978_v0 }
 0x2da   : > { %v4976_v63 = vpop.f32.mrf.mxu3 }
 0x2db   : > { %5601 = vst [vmem:[#allocation43_spill] sm:$0xff] %v4976_v63 }
 0x2de   : > { %v4980_v3 = vpop.f32.mrf.mxu2 }
 0x2df   : > { %5603 = vst [vmem:[#allocation45_spill] sm:$0xff] %v4980_v3 }
 0x2e0   : > { %v4982_v9 = vpop.f32.mrf.mxu1  ;;  %v4984_v14 = vpop.f32.mrf.mxu0 }
 0x2e1   : > { %5604 = vst [vmem:[#allocation46_spill] sm:$0xff] %v4982_v9 }
 0x2e2   : > { %v1692_v12 = vpop.f32.mrf.mxu3  ;;  %5605 = vst [vmem:[#allocation47_spill] sm:$0xff] %v4984_v14 }
 0x2e3   : > { %v1760_v14 = vadd.f32 %v1743_v47, %v1692_v12 }
 0x2e6   : > { %v1825_v23 = vpop.f32.mrf.mxu2 }
 0x2e7   : > { %v1873_v27 = vadd.f32 %v1825_v23, %v1760_v14  ;;  %v5013_v14 = vpop.permute.xlu0 %2038 }
 0x2e8   : > { %v4986_v15 = vpop.f32.mrf.mxu1  ;;  %v1711_v13 = vpop.f32.mrf.mxu0 }
 0x2e9   : > { %5606 = vst [vmem:[#allocation48_spill] sm:$0xff] %v4986_v15  ;;  %v1761_v9 = vadd.f32 %v1743_v47, %v1711_v13  ;;  %v4042_v13 = vunpack.i.h.bf16 %v4040_v21 }
 0x2ea   : > { %v1694_v28 = vpop.f32.mrf.mxu3 }
 0x2eb   : > { %v1763_v56 = vadd.f32 %v5006_v46, %v1694_v28  ;;  %v5018_v21 = vsel %vm1799_vm0, %v4042_v13, %v5013_v14 }
 0x2ee   : > { %v1827_v20 = vpop.f32.mrf.mxu2 }
 0x2f0   : > { %v4988_v30 = vpop.f32.mrf.mxu1  ;;  %v1713_v38 = vpop.f32.mrf.mxu0 }
 0x2f1   : > { %v1764_v50 = vadd.f32 %v5006_v46, %v1713_v38 }
 0x2f2   : > { %v1697_v33 = vpop.f32.mrf.mxu3 }
 0x2f6   : > { %v4990_v59 = vpop.f32.mrf.mxu2 }
 0x2f8   : > { %v4992_v35 = vpop.f32.mrf.mxu1  ;;  %v1716_v43 = vpop.f32.mrf.mxu0 }
 0x2fa   : > { %v4994_v11 = vpop.f32.mrf.mxu3 }
 0x2fe   : > { %v4996_v39 = vpop.f32.mrf.mxu2 }
 0x300   : > { %v4998_v7 = vpop.f32.mrf.mxu1  ;;  %v1718_v0 = vpop.f32.mrf.mxu0 }
 0x302   : > { %v1844_v29 = vpop.f32.mrf.mxu3 }
 0x303   : > { %v1874_v15 = vadd.f32 %v1844_v29, %v1761_v9  ;;  %v5011_v9 = vsel %vm1799_vm0, %v4041_v52, %v4042_v13 }
 0x306   : > { %v1957_v44 = vpop.f32.mrf.mxu2 }
 0x307   : > { %v1987_v63 = vadd.f32 %v1957_v44, %v1874_v15  ;;  %v1770_v44 = vadd.f32 %v5004_v18, %v1718_v0 }
 0x308   : > { %v5002_v45 = vpop.f32.mrf.mxu1  ;;  %v1863_v15 = vpop.f32.mrf.mxu0 }
 0x309   : > { %v2011_v10 = vmul.f32 0.1, %v1987_v63  ;;  %vm1999_vm3 = vcmp.gt.f32.partialorder %v1987_v63, 0.0 }
 0x30a   : > { %v1846_v3 = vpop.f32.mrf.mxu3 }
 0x30b   : > { %v1877_v41 = vadd.f32 %v1846_v3, %v1764_v50  ;;  %v1876_v50 = vadd.f32 %v1827_v20, %v1763_v56  ;;  %v1767_v3 = vadd.f32 %v5000_v55, %v1716_v43  ;;  %v1766_v56 = vadd.f32 %v5000_v55, %v1697_v33 }
 0x30e   : > { %v1959_v49 = vpop.f32.mrf.mxu2 }
 0x30f   : > { %v1990_v8 = vadd.f32 %v1959_v49, %v1877_v41  ;;  %v2023_v41 = vsel %vm1999_vm3, %v1987_v63, %v2011_v10  ;;  %vm3238_vm3 = vcmask 48128  }
 0x310   : > { %v1938_v42 = vpop.f32.mrf.mxu1 }
 0x311   : > { %v1986_v34 = vadd.f32 %v1938_v42, %v1873_v27  ;;  %v2014_v23 = vmul.f32 0.1, %v1990_v8  ;;  %vm2002_vm4 = vcmp.gt.f32.partialorder %v1990_v8, 0.0 }
 0x312   : > { %v1849_v19 = vpop.f32.mrf.mxu3 }
 0x313   : > { %v2010_v12 = vmul.f32 0.1, %v1986_v34  ;;  %vm1998_vm2 = vcmp.gt.f32.partialorder %v1986_v34, 0.0  ;;  %v1880_v49 = vadd.f32 %v1849_v19, %v1767_v3  ;;  %v2026_v20 = vsel %vm2002_vm4, %v1990_v8, %v2014_v23 }
 0x314   : > { %v2050_v63 = vmul.f32 %v5018_v21, %v2026_v20  ;;  %v1879_v3 = vadd.f32 %v4990_v59, %v1766_v56 }
 0x315   : > { %v2022_v42 = vsel %vm1998_vm2, %v1986_v34, %v2010_v12  ;;  %v2047_v34 = vmul.f32 %v5018_v21, %v2023_v41  ;;  %vm2801_vm2 = vcmask 15360  }
 0x316   : > { %v1962_v27 = vpop.f32.mrf.mxu2  ;;  %v2046_v52 = vmul.f32 %v5011_v9, %v2022_v42 }
 0x317   : > { %v1993_v12 = vadd.f32 %v1962_v27, %v1880_v49  ;;  %v1865_v49 = vpop.f32.mrf.mxu0 }
 0x318   : > { %v1940_v28 = vpop.f32.mrf.mxu1  ;;  %v2058_v19 = vpack.c.bf16 %v2047_v34, %v2046_v52 }
 0x319   : > { %v1989_v38 = vadd.f32 %v1940_v28, %v1876_v50  ;;  %v1762_v50 = vadd.f32 %v1743_v47, %v4988_v30  ;;  %v1769_v28 = vadd.f32 %v5004_v18, %v4994_v11  ;;  %v2017_v0 = vmul.f32 0.1, %v1993_v12 }
 0x31a   : > { %v1851_v29 = vpop.f32.mrf.mxu3  ;;  %v2091_v20 = vunpack.c.h.b16 %v2058_v19  ;;  %vm2005_vm7 = vcmp.gt.f32.partialorder %v1993_v12, 0.0 }
 0x31b   : > { %vm2001_vm5 = vcmp.gt.f32.partialorder %v1989_v38, 0.0  ;;  %v2013_v43 = vmul.f32 0.1, %v1989_v38  ;;  %v1883_v42 = vadd.f32 %v1851_v29, %v1770_v44  ;;  %v1875_v41 = vadd.f32 %v1863_v15, %v1762_v50 }
 0x31c   : > { %v1765_v15 = vadd.f32 %v5006_v46, %v4992_v35  ;;  %v1882_v44 = vadd.f32 %v4996_v39, %v1769_v28 }
 0x31d   : > { %v2025_v10 = vsel %vm2001_vm5, %v1989_v38, %v2013_v43 }
 0x31e   : > { %v2049_v13 = vmul.f32 %v5011_v9, %v2025_v10  ;;  %v1964_v33 = vpop.f32.mrf.mxu2  ;;  %v2090_v10 = vunpack.c.l.b16 %v2058_v19  ;;  %v1878_v50 = vadd.f32 %v1865_v49, %v1765_v15  ;;  %v1768_v49 = vadd.f32 %v5000_v55, %v4998_v7 }
 0x31f   : > { %v1996_v34 = vadd.f32 %v1964_v33, %v1883_v42  ;;  %v1771_v55 = vadd.f32 %v5004_v18, %v5002_v45 }
 0x320   : > { %v1943_v8 = vpop.f32.mrf.mxu1  ;;  %v2060_v23 = vpack.c.bf16 %v2050_v63, %v2049_v13  ;;  %v2029_v63 = vsel %vm2005_vm7, %v1993_v12, %v2017_v0 }
 0x321   : > { %v1992_v27 = vadd.f32 %v1943_v8, %v1879_v3  ;;  %v2020_v13 = vmul.f32 0.1, %v1996_v34  ;;  %vm2008_vm9 = vcmp.gt.f32.partialorder %v1996_v34, 0.0  ;;  %v2053_v8 = vmul.f32 %v5018_v21, %v2029_v63 }
 0x322   : > { %v1976_v38 = vpop.f32.mrf.mxu3  ;;  %v2093_v43 = vunpack.c.h.b16 %v2060_v23  ;;  %v2092_v52 = vunpack.c.l.b16 %v2060_v23 }
 0x323   : > { %vm2004_vm6 = vcmp.gt.f32.partialorder %v1992_v27, 0.0  ;;  %v2016_v47 = vmul.f32 0.1, %v1992_v27  ;;  %v1988_v30 = vadd.f32 %v1976_v38, %v1875_v41  ;;  %v2032_v41 = vsel %vm2008_vm9, %v1996_v34, %v2020_v13 }
 0x324   : > { %v5030_v59 = vpack.c.b16 %v2093_v43, %v2091_v20  ;;  %v5032_v29 = vpack.c.b16 %v2092_v52, %v2090_v10  ;;  %v1868_v20 = vpop.f32.mrf.mxu0  ;;  %v2056_v28 = vmul.f32 %v5018_v21, %v2032_v41 }
 0x325   : > { %v2012_v56 = vmul.f32 0.1, %v1988_v30  ;;  %v2028_v11 = vsel %vm2004_vm6, %v1992_v27, %v2016_v47  ;;  %vm2000_vm8 = vcmp.gt.f32.partialorder %v1988_v30, 0.0  ;;  %v1881_v47 = vadd.f32 %v1868_v20, %v1768_v49  ;;  %v3865_v49 = vld [vmem:[%s5585_s11 + $0x38] sm:$0xff] }
 0x326   : > { %2205 = vrot.lane.b32.xlu2 %v5030_v59, %s4330_s13  ;;  %2203 = vrot.lane.b32.xlu1 %v5032_v29, %s4330_s13  ;;  %v2052_v3 = vmul.f32 %v5011_v9, %v2028_v11 }
 0x327   : > { %v2024_v42 = vsel %vm2000_vm8, %v1988_v30, %v2012_v56 }
 0x328   : > { %v1945_v19 = vpop.f32.mrf.mxu1  ;;  %v2048_v46 = vmul.f32 %v5013_v14, %v2024_v42  ;;  %v2062_v12 = vpack.c.bf16 %v2053_v8, %v2052_v3 }
 0x329   : > { %v1995_v33 = vadd.f32 %v1945_v19, %v1882_v44 }
 0x32a   : > { %v1978_v23 = vpop.f32.mrf.mxu3  ;;  %v2059_v34 = vpack.c.bf16 %v2048_v46, %v2048_v46  ;;  %v2095_v30 = vunpack.c.h.b16 %v2062_v12  ;;  %v2094_v15 = vunpack.c.l.b16 %v2062_v12 }
 0x32b   : > { %vm2007_vm10 = vcmp.gt.f32.partialorder %v1995_v33, 0.0  ;;  %v2019_v27 = vmul.f32 0.1, %v1995_v33  ;;  %v1991_v38 = vadd.f32 %v1978_v23, %v1878_v50 }
 0x32c   : > { %v2197_v50 = vunpack.c.l.b16 %v2059_v34  ;;  %v1870_v42 = vpop.f32.mrf.mxu0 }
 0x32d   : > { %v2031_v35 = vsel %vm2007_vm10, %v1995_v33, %v2019_v27  ;;  %vm2003_vm11 = vcmp.gt.f32.partialorder %v1991_v38, 0.0  ;;  %v2015_v39 = vmul.f32 0.1, %v1991_v38  ;;  %v1884_v33 = vadd.f32 %v1870_v42, %v1771_v55 }
 0x32e   : > { %v2055_v0 = vmul.f32 %v5011_v9, %v2031_v35 }
 0x32f   : > { %v2027_v43 = vsel %vm2003_vm11, %v1991_v38, %v2015_v39 }
 0x330   : > { %v2064_v10 = vpack.c.bf16 %v2056_v28, %v2055_v0  ;;  %v2051_v52 = vmul.f32 %v5013_v14, %v2027_v43  ;;  %v1329_v28 = vld [vmem:[#allocation5 + $0x38] sm:$0xff]  ;;  %v1328_v43 = vld [vmem:[#allocation5 + $0x30] sm:$0xff] }
 0x332   : > { %v1981_v56 = vpop.f32.mrf.mxu3  ;;  %v2097_v11 = vunpack.c.h.b16 %v2064_v10  ;;  %v2096_v44 = vunpack.c.l.b16 %v2064_v10  ;;  %v2061_v63 = vpack.c.bf16 %v2051_v52, %v2051_v52 }
 0x333   : > { %v1994_v13 = vadd.f32 %v1981_v56, %v1881_v47 }
 0x334   : > { %v2101_v19 = vpack.c.b16 %v2097_v11, %v2095_v30  ;;  %v2100_v21 = vpack.c.b16 %v2096_v44, %v2094_v15  ;;  %v2198_v9 = vunpack.c.l.b16 %v2061_v63  ;;  %v3866_v11 = vld [vmem:[%s5585_s11 + $0x40] sm:$0xff] }
 0x335   : > { %v2018_v3 = vmul.f32 0.1, %v1994_v13  ;;  %vm2006_vm0 = vcmp.gt.f32.partialorder %v1994_v13, 0.0 }
 0x336   : > { %2211 = vrot.lane.b32.xlu2 %v2101_v19, %s4330_s13  ;;  %2137 = vmatpush.bf16.msra.mxu1 %v2101_v19  ;;  %v2201_v7 = vpack.c.b16 %v2198_v9, %v2197_v50 }
 0x337   : > { %2209 = vrot.lane.b32.xlu1 %v2100_v21, %s4330_s13  ;;  %2118 = vmatpush.bf16.msra.mxu0 %v2100_v21  ;;  %v2030_v8 = vsel %vm2006_vm0, %v1994_v13, %v2018_v3  ;;  %v3868_v3 = vld [vmem:[%s5585_s11 + $0x50] sm:$0xff] }
 0x338   : > { %2207 = vrot.lane.b32.xlu0 %v2201_v7, %s4330_s13  ;;  %v2054_v27 = vmul.f32 %v5013_v14, %v2030_v8 }
 0x33a   : > { %v1983_v23 = vpop.f32.mrf.mxu3  ;;  %2138 = vmatpush.bf16.msra.mxu1 %v5030_v59  ;;  %v2063_v20 = vpack.c.bf16 %v2054_v27, %v2054_v27 }
 0x33b   : > { %v1997_v41 = vadd.f32 %v1983_v23, %v1884_v33  ;;  %2119 = vmatpush.bf16.msra.mxu0 %v5032_v29 }
 0x33c   : > { %v2199_v35 = vunpack.c.l.b16 %v2063_v20 }
 0x33d   : > { %vm2009_vm1 = vcmp.gt.f32.partialorder %v1997_v41, 0.0  ;;  %v2021_v38 = vmul.f32 0.1, %v1997_v41 }
 0x33e   : > { %2298 = vrot.lane.b32.xlu2 %v2101_v19, %s4331_s14 }
 0x33f   : > { %v2033_v18 = vsel %vm2009_vm1, %v1997_v41, %v2021_v38  ;;  %2296 = vrot.lane.b32.xlu1 %v2100_v21, %s4331_s14  ;;  %v3869_v41 = vld [vmem:[%s5585_s11 + $0x58] sm:$0xff]  ;;  %v3870_v38 = vld [vmem:[#allocation10] sm:$0xff] }
 0x340   : > { %v2057_v45 = vmul.f32 %v5013_v14, %v2033_v18  ;;  %v3864_v14 = vld [vmem:[%s5585_s11 + $0x30] sm:$0xff] }
 0x341   : > { %3676 = vmatmul.msk.bf16.vlgmr.msra.gmra.mxu0 %vm932_vm13, %v3864_v14  ;;  %3678 = vmatmul.msk.bf16.vlgmr.msra.gmra.mxu1 %vm932_vm13, %v3864_v14 }
 0x342   : > { %v2065_v46 = vpack.c.bf16 %v2057_v45, %v2057_v45 }
 0x344   : > { %v2200_v39 = vunpack.c.l.b16 %v2065_v46 }
 0x346   : > { %2292 = vrot.lane.b32.xlu2 %v5030_v59, %s4331_s14  ;;  %v2202_v12 = vpack.c.b16 %v2200_v39, %v2199_v35  ;;  %v1327_v59 = vld [vmem:[#allocation5 + $0x28] sm:$0xff] }
 0x347   : > { %2290 = vrot.lane.b32.xlu1 %v5032_v29, %s4331_s14  ;;  %v1326_v29 = vld [vmem:[#allocation5 + $0x20] sm:$0xff] }
 0x348   : > { %2213 = vrot.lane.b32.xlu0 %v2202_v12, %s4330_s13  ;;  %s4337_s13 = smov 116  }
 0x34e   : > { %2713 = vrot.lane.b32.xlu2 %v4594_v6, %s4333_s7 }
 0x34f   : > { %2711 = vrot.lane.b32.xlu1 %v4592_v1, %s4333_s7 }
 0x350   : > { %2300 = vrot.lane.b32.xlu0 %v2202_v12, %s4331_s14  ;;  %v3872_v12 = vld [vmem:[#allocation10 + $0x10] sm:$0xff] }
 0x351   : > { %3677 = vmatmul.msk.bf16.gmra.mxu0 %vm932_vm13, %v3865_v49  ;;  %3679 = vmatmul.msk.bf16.gmra.mxu1 %vm932_vm13, %v3865_v49 }
 0x356   : > { %2707 = vrot.lane.b32.xlu2 %v4606_v17, %s4333_s7 }
 0x357   : > { %2705 = vrot.lane.b32.xlu1 %v4604_v16, %s4333_s7 }
 0x358   : > { %2294 = vrot.lane.b32.xlu0 %v2201_v7, %s4331_s14 }
 0x35e   : > { %3061 = vrot.lane.b32.xlu2 %v4594_v6, %s4336_s12 }
 0x35f   : > { %3059 = vrot.lane.b32.xlu1 %v4592_v1, %s4336_s12 }
 0x360   : > { %2715 = vrot.lane.b32.xlu0 %v4621_v32, %s4333_s7 }
 0x366   : > { %3055 = vrot.lane.b32.xlu2 %v4606_v17, %s4336_s12 }
 0x367   : > { %3053 = vrot.lane.b32.xlu1 %v4604_v16, %s4336_s12 }
 0x368   : > { %2709 = vrot.lane.b32.xlu0 %v4630_v36, %s4333_s7 }
 0x36e   : > { %3149 = vrot.lane.b32.xlu2 %v4594_v6, %s4337_s13 }
 0x36f   : > { %3147 = vrot.lane.b32.xlu1 %v4592_v1, %s4337_s13 }
 0x370   : > { %3063 = vrot.lane.b32.xlu0 %v4621_v32, %s4336_s12 }
 0x376   : > { %3143 = vrot.lane.b32.xlu2 %v4606_v17, %s4337_s13 }
 0x377   : > { %3141 = vrot.lane.b32.xlu1 %v4604_v16, %s4337_s13 }
 0x378   : > { %3057 = vrot.lane.b32.xlu0 %v4630_v36, %s4336_s12  ;;  %s3490_s12 = sshll.u32 %s4549_s27, 5 }
 0x37e   : > { %1416 = vperm.xlu2 %4032, %v1327_v59  }
 0x37f   : > { %1411 = vperm.xlu1 %4031, %v1326_v29   ;;  %v3871_v29 = vld [vmem:[#allocation10 + $0x8] sm:$0xff] }
 0x380   : > { %3151 = vrot.lane.b32.xlu0 %v4621_v32, %s4337_s13  ;;  %v2206_v0 = vpop.permute.xlu2 %2205 }
 0x387   : > { %1426 = vperm.xlu1 %4031, %v1329_v28  }
 0x388   : > { %3145 = vrot.lane.b32.xlu0 %v4630_v36, %s4337_s13  ;;  %s5628_s13 = sld [smem:[#allocation23_spill]] }
 0x38e   : > { %s3890_s14 = sshll.u32 %s5628_s13, 5 }
 0x38f   : > { %s3272_s23 = scalar_lea.hbm %s5629_s29, %s3890_s14 }
 0x390   : > { %v2212_v10 = vpop.permute.xlu2 %2211  ;;  %1421 = vperm.xlu0 %4030, %v1328_v43   ;;  %v3873_v43 = vld [vmem:[#allocation10 + $0x18] sm:$0xff]  ;;  %s3275_s5 = sshll.u32 %s3272_s23, 4  ;;  %s3276_s5 = int_to_ptr.hbm [resolvable:$true] %s3275_s5 }
 0x391   : > { %s4237_s15 = sshra.s32 %s3276_s5, 4  ;;  %s4238_s15 = int_to_ptr.hbm [resolvable:$true] %s4237_s15 }
 0x392   : > { %s4239_s6 = scalar_lea.hbm %s4238_s15, 32  ;;  %p4244_p7 = scmp.lt.s32.totalorder %s4238_s15, %s5629_s29 }
 0x393   : > { %p4240_p3 = scmp.ne.s32.totalorder %s4238_s15, %s4239_s6 }
 0x395   : > { %p4241_p4 = pnand %p4240_p3, %p4447_p5 }
 0x397   : > { %p4242_p6 = pneg %p4241_p4 }
 0x398   : > { %v2299_v52 = vpop.permute.xlu2 %2298  ;;  %v2204_v47 = vpop.permute.xlu1 %2203 }
 0x399   : > { %v2215_v36 = vsel %vm1055_vm15, %v2204_v47, %v2206_v0 }
 0x3a0   : > { %v2293_v34 = vpop.permute.xlu2 %2292 }
 0x3a8   : > { %v5101_v32 = vpop.permute.xlu2 %2713 }
 0x3a9   : > { %v2210_v30 = vpop.permute.xlu1 %2209 }
 0x3aa   : > { %v2217_v56 = vsel %vm1055_vm15, %v2210_v30, %v2212_v10  ;;  %v2208_v63 = vpop.permute.xlu0 %2207 }
 0x3ab   : > { %2235 = vmatpush.bf16.msrb.mxu2 %v2217_v56 }
 0x3af   : > { %2236 = vmatpush.bf16.msrb.mxu2 %v2215_v36  ;;  %v5608_v36 = vld [vmem:[#allocation39_spill] sm:$0xff] }
 0x3b0   : > { %v5109_v15 = vpop.permute.xlu2 %2707 }
 0x3b1   : > { %v2297_v44 = vpop.permute.xlu1 %2296 }
 0x3b2   : > { %v2304_v13 = vsel %vm1168_vm14, %v2297_v44, %v2299_v52  ;;  %3692 = vmatmul.msk.bf16.vlgmr.msrb.gmra.mxu2 %vm932_vm13, %v3866_v11 }
 0x3b3   : > { %2429 = vmatpush.bf16.msra.mxu2 %v4592_v1  ;;  %2322 = vmatpush.bf16.msrb.mxu0 %v2304_v13  ;;  %v5612_v13 = vld [vmem:[#allocation38_spill] sm:$0xff] }
 0x3b7   : > { %2430 = vmatpush.bf16.msra.mxu2 %v4604_v16 }
 0x3b8   : > { %v5115_v19 = vpop.permute.xlu2 %3061 }
 0x3b9   : > { %v2291_v21 = vpop.permute.xlu1 %2290 }
 0x3ba   : > { %v2302_v50 = vsel %vm1168_vm14, %v2291_v21, %v2293_v34  ;;  %v2214_v9 = vpop.permute.xlu0 %2213  ;;  %v3875_v21 = vld [vmem:[#allocation10 + $0x28] sm:$0xff] }
 0x3bb   : > { %2583 = vmatpush.bf16.msrb.mxu2 %v4653_v40  ;;  %2323 = vmatpush.bf16.msrb.mxu0 %v2302_v50  ;;  %v2218_v42 = vsel %vm1055_vm15, %v2212_v10, %v2214_v9  ;;  %v3867_v40 = vld [vmem:[%s5585_s11 + $0x48] sm:$0xff]  ;;  %v3874_v10 = vld [vmem:[#allocation10 + $0x20] sm:$0xff] }
 0x3bc   : > { %2254 = vmatpush.bf16.msrb.mxu3 %v2218_v42  ;;  %v5613_v50 = vld [vmem:[#allocation28_spill] sm:$0xff]  ;;  %v5615_v42 = vld [vmem:[#allocation31_spill] sm:$0xff] }
 0x3be   : > { %3708 = vmatmul.msk.bf16.vlgmr.msrb.gmra.mxu0 %vm932_vm13, %v3868_v3 }
 0x3bf   : > { %2584 = vmatpush.bf16.msrb.mxu2 %v4682_v61  ;;  %2516 = vmatpush.bf16.msra.mxu0 %v4659_v48  ;;  %v2216_v61 = vsel %vm1055_vm15, %v2206_v0, %v2208_v63  ;;  %vm3065_vm15 = vcmask 973824   ;;  %v5611_v63 = vld [vmem:[#allocation36_spill] sm:$0xff] }
 0x3c0   : > { %v5130_v7 = vpop.permute.xlu2 %3055  ;;  %2255 = vmatpush.bf16.msrb.mxu3 %v2216_v61 }
 0x3c1   : > { %v2712_v55 = vpop.permute.xlu1 %2711 }
 0x3c2   : > { %3693 = vmatmul.msk.bf16.gmra.mxu2 %vm932_vm13, %v3867_v40  ;;  %v2301_v48 = vpop.permute.xlu0 %2300 }
 0x3c3   : > { %2517 = vmatpush.bf16.msra.mxu0 %v4663_v51  ;;  %v2305_v33 = vsel %vm1168_vm14, %v2299_v52, %v2301_v48  ;;  %3694 = vmatmul.msk.bf16.vlgmr.msrb.gmra.mxu3 %vm932_vm13, %v3866_v11  ;;  %v5609_v11 = vld [vmem:[#allocation37_spill] sm:$0xff] }
 0x3c4   : > { %2448 = vmatpush.bf16.msra.mxu3 %v4594_v6  ;;  %2341 = vmatpush.bf16.msrb.mxu1 %v2305_v33  ;;  %v5618_v33 = vld [vmem:[#allocation41_spill] sm:$0xff] }
 0x3c7   : > { %2650 = vmatpush.bf16.msrb.mxu0 %v4870_v26 }
 0x3c8   : > { %2449 = vmatpush.bf16.msra.mxu3 %v4606_v17  ;;  %v5140_v51 = vpop.permute.xlu2 %3149 }
 0x3c9   : > { %v2706_v8 = vpop.permute.xlu1 %2705 }
 0x3ca   : > { %v2295_v23 = vpop.permute.xlu0 %2294  ;;  %v2717_v20 = vsel %vm1561_vm12, %v2706_v8, %v5109_v15 }
 0x3cb   : > { %2651 = vmatpush.bf16.msrb.mxu0 %v4882_v4  ;;  %v2303_v27 = vsel %vm1168_vm14, %v2293_v34, %v2295_v23  ;;  %v5619_v23 = vld [vmem:[#allocation44_spill] sm:$0xff]  ;;  %vm3153_vm14 = vcmask 949248  }
 0x3cc   : > { %2602 = vmatpush.bf16.msrb.mxu3 %v4670_v54  ;;  %2342 = vmatpush.bf16.msrb.mxu1 %v2303_v27  ;;  %v2719_v54 = vsel %vm1561_vm12, %v2712_v55, %v5101_v32  ;;  %v5617_v55 = vld [vmem:[#allocation33_spill] sm:$0xff]  ;;  %v5620_v27 = vld [vmem:[#allocation48_spill] sm:$0xff] }
 0x3ce   : > { %3709 = vmatmul.msk.bf16.gmra.mxu0 %vm932_vm13, %v3869_v41 }
 0x3cf   : > { %3710 = vmatmul.msk.bf16.vlgmr.msrb.gmra.mxu1 %vm932_vm13, %v3868_v3 }
 0x3d0   : > { %2603 = vmatpush.bf16.msrb.mxu3 %v4696_v2  ;;  %2535 = vmatpush.bf16.msra.mxu1 %v4675_v57  ;;  %v5152_v2 = vpop.permute.xlu2 %3143 }
 0x3d1   : > { %v3060_v18 = vpop.permute.xlu1 %3059 }
 0x3d2   : > { %v5157_v45 = vsel %vm3065_vm15, %v3060_v18, %v5115_v19  ;;  %3720 = vmatmul.msk.bf16.vlgmr.msra.gmra.mxu2 %vm932_vm13, %v3870_v38  ;;  %v2716_v57 = vpop.permute.xlu0 %2715 }
 0x3d3   : > { %3695 = vmatmul.msk.bf16.gmra.mxu3 %vm932_vm13, %v3867_v40  ;;  %2737 = vmatpush.bf16.msra.mxu2 %v2719_v54  ;;  %v5616_v40 = vld [vmem:[#allocation34_spill] sm:$0xff]  ;;  %v5621_v54 = vld [vmem:[#allocation35_spill] sm:$0xff] }
 0x3d4   : > { %2536 = vmatpush.bf16.msra.mxu1 %v4679_v60 }
 0x3d7   : > { %2738 = vmatpush.bf16.msra.mxu2 %v2717_v20 }
 0x3d8   : > { %2669 = vmatpush.bf16.msrb.mxu1 %v4862_v5  ;;  %v1417_v46 = vpop.permute.xlu2 %1416 }
 0x3d9   : > { %v1431_v60 = vadd.f32 %v1417_v46, %v4946_v37  ;;  %v5166_v35 = vpop.permute.xlu1 %3053  ;;  %v2720_v37 = vsel %vm1561_vm12, %v5101_v32, %v2716_v57  ;;  %v5622_v57 = vld [vmem:[#allocation42_spill] sm:$0xff] }
 0x3da   : > { %v2710_v39 = vpop.permute.xlu0 %2709 }
 0x3db   : > { %v1528_v14 = vadd.f32 %v4962_v58, %v1431_v60 }
 0x3dc   : > { %2670 = vmatpush.bf16.msrb.mxu1 %v4877_v31 }
 0x3dd   : > { %v1616_v59 = vadd.f32 %v4974_v62, %v1528_v14  ;;  %v2068_v14 = vld [vmem:[#allocation8 + $0x28] sm:$0xff] }
 0x3de   : > { %3732 = vmatmul.msk.bf16.vlgmr.msra.gmra.mxu0 %vm932_vm13, %v3872_v12 }
 0x3df   : > { %1634 = vrot.lane.b32.xlu1 %v1616_v59, %s4338_s24  ;;  %3711 = vmatmul.msk.bf16.gmra.mxu1 %vm932_vm13, %v3869_v41  ;;  %v3878_v59 = vld [vmem:[#allocation10 + $0x40] sm:$0xff] }
 0x3e0   : > { %2844 = vmatpush.bf16.msra.mxu0 %v4592_v1  ;;  %v2718_v1 = vsel %vm1561_vm12, %v5109_v15, %v2710_v39  ;;  %v5624_v39 = vld [vmem:[#allocation47_spill] sm:$0xff]  ;;  %vm1646_vm12 = vcmask 23552  }
 0x3e1   : > { %v5176_v28 = vpop.permute.xlu1 %3147 }
 0x3e2   : > { %3721 = vmatmul.msk.bf16.gmra.mxu2 %vm932_vm13, %v3871_v29  ;;  %v3064_v58 = vpop.permute.xlu0 %3063 }
 0x3e3   : > { %v5181_v62 = vsel %vm3065_vm15, %v5115_v19, %v3064_v58  ;;  %3722 = vmatmul.msk.bf16.vlgmr.msra.gmra.mxu3 %vm932_vm13, %v3870_v38 }
 0x3e4   : > { %2845 = vmatpush.bf16.msra.mxu0 %v4604_v16  ;;  %2756 = vmatpush.bf16.msra.mxu3 %v2720_v37  ;;  %v5625_v37 = vld [vmem:[#allocation45_spill] sm:$0xff] }
 0x3e8   : > { %2757 = vmatpush.bf16.msra.mxu3 %v2718_v1  ;;  %v5626_v1 = vld [vmem:[#allocation29_spill] sm:$0xff] }
 0x3e9   : > { %v5187_v0 = vpop.permute.xlu1 %3141 }
 0x3ea   : > { %v5189_v49 = vpop.permute.xlu0 %3057 }
 0x3ee   : > { %3733 = vmatmul.msk.bf16.gmra.mxu0 %vm932_vm13, %v3873_v43 }
 0x3ef   : > { %3734 = vmatmul.msk.bf16.vlgmr.msra.gmra.mxu1 %vm932_vm13, %v3872_v12 }
 0x3f0   : > { %2863 = vmatpush.bf16.msra.mxu1 %v4594_v6  ;;  %v5607_v6 = vld [vmem:[#allocation32_spill] sm:$0xff] }
 0x3f1   : > { %v1412_v52 = vpop.permute.xlu1 %1411  ;;  %v1432_v56 = vadd.f32 %v1417_v46, %v5607_v6  ;;  %v5623_v46 = vld [vmem:[#allocation46_spill] sm:$0xff] }
 0x3f2   : > { %v1429_v16 = vadd.f32 %v1412_v52, %v4941_v25  ;;  %v1430_v34 = vadd.f32 %v1412_v52, %v4938_v22  ;;  %3744 = vmatmul.msk.bf16.vlgmr.msrb.gmra.mxu2 %vm932_vm13, %v3874_v10  ;;  %v5197_v47 = vpop.permute.xlu0 %3151  ;;  %v2401_v52 = vld [vmem:[#allocation11 + $0x10] sm:$0xff] }
 0x3f3   : > { %2931 = vmatpush.bf16.msrb.mxu2 %v4870_v26  ;;  %3723 = vmatmul.msk.bf16.gmra.mxu3 %vm932_vm13, %v3871_v29  ;;  %v5610_v26 = vld [vmem:[#allocation40_spill] sm:$0xff] }
 0x3f4   : > { %v1526_v32 = vadd.f32 %v4954_v24, %v1429_v16  ;;  %v1527_v30 = vadd.f32 %v4960_v53, %v1430_v34  ;;  %2864 = vmatpush.bf16.msra.mxu1 %v4606_v17  ;;  %v1529_v15 = vadd.f32 %v5610_v26, %v1432_v56  ;;  %v3876_v24 = vld [vmem:[#allocation10 + $0x30] sm:$0xff]  ;;  %v2067_v29 = vld [vmem:[#allocation8 + $0x20] sm:$0xff]  ;;  %v2070_v16 = vld [vmem:[#allocation8 + $0x38] sm:$0xff]  ;;  %v5267_v26 = vpop.f32.mrf.mxu1 }
 0x3f5   : > { %v2069_v34 = vld [vmem:[#allocation8 + $0x30] sm:$0xff]  ;;  %v3879_v56 = vld [vmem:[#allocation10 + $0x48] sm:$0xff] }
 0x3f6   : > { %v1614_v25 = vadd.f32 %v5608_v36, %v1526_v32  ;;  %v1615_v22 = vadd.f32 %v5609_v11, %v1527_v30  ;;  %v1617_v19 = vadd.f32 %v5612_v13, %v1529_v15  ;;  %v3880_v32 = vld [vmem:[#allocation13] sm:$0xff]  ;;  %v3156_v30 = vsel %vm3153_vm14, %v5176_v28, %v5140_v51  ;;  %v2814_v11 = vld [vmem:[#allocation14] sm:$0xff] }
 0x3f7   : > { %2932 = vmatpush.bf16.msrb.mxu2 %v4882_v4  ;;  %v5614_v4 = vld [vmem:[#allocation43_spill] sm:$0xff]  ;;  %v2399_v36 = vld [vmem:[#allocation11] sm:$0xff]  ;;  %v3067_v28 = vsel %vm3065_vm15, %v5130_v7, %v5189_v49 }
 0x3f8   : > { %1630 = vrot.lane.b32.xlu2 %v1614_v25, %s4338_s24  ;;  %1632 = vrot.lane.b32.xlu0 %v1615_v22, %s4338_s24  ;;  %v3154_v25 = vsel %vm3153_vm14, %v5187_v0, %v5152_v2  ;;  %v2402_v22 = vld [vmem:[#allocation11 + $0x18] sm:$0xff]  ;;  %v3881_v0 = vld [vmem:[#allocation13 + $0x8] sm:$0xff]  ;;  %v3884_v13 = vld [vmem:[#allocation13 + $0x20] sm:$0xff] }
 0x3f9   : > { %v1427_v53 = vpop.permute.xlu1 %1426 }
 0x3fa   : > { %v5211_v44 = vpop.permute.xlu0 %3145  ;;  %v1435_v17 = vadd.f32 %v1427_v53, %v5611_v63  ;;  %v1436_v18 = vadd.f32 %v1427_v53, %v5621_v54  ;;  %v2817_v53 = vld [vmem:[#allocation14 + $0x18] sm:$0xff]  ;;  %v2816_v63 = vld [vmem:[#allocation14 + $0x10] sm:$0xff] }
 0x3fc   : > { %v1532_v9 = vadd.f32 %v5614_v4, %v1435_v17  ;;  %v1533_v12 = vadd.f32 %v5624_v39, %v1436_v18  ;;  %v3155_v17 = vsel %vm3153_vm14, %v5152_v2, %v5211_v44  ;;  %v3888_v18 = vld [vmem:[#allocation13 + $0x40] sm:$0xff]  ;;  %v3887_v39 = vld [vmem:[#allocation13 + $0x38] sm:$0xff] }
 0x3fe   : > { %3756 = vmatmul.msk.bf16.vlgmr.msrb.gmra.mxu0 %vm932_vm13, %v3876_v24  ;;  %v1620_v38 = vadd.f32 %v5620_v27, %v1532_v9  ;;  %v1621_v58 = vadd.f32 %v5625_v37, %v1533_v12 }
 0x3ff   : > { %2998 = vmatpush.bf16.msrb.mxu0 %v5613_v50  ;;  %3735 = vmatmul.msk.bf16.gmra.mxu1 %vm932_vm13, %v3873_v43  ;;  %v5627_v43 = vld [vmem:[#allocation30_spill] sm:$0xff]  ;;  %v3883_v50 = vld [vmem:[#allocation13 + $0x18] sm:$0xff] }
 0x400   : > { %1636 = vrot.lane.b32.xlu2 %v1617_v19, %s4338_s24 }
 0x402   : > { %3745 = vmatmul.msk.bf16.gmra.mxu2 %vm932_vm13, %v3875_v21  ;;  %v1422_v3 = vpop.permute.xlu0 %1421 }
 0x403   : > { %2999 = vmatpush.bf16.msrb.mxu0 %v5615_v42  ;;  %v1433_v61 = vadd.f32 %v1422_v3, %v5616_v40  ;;  %v1434_v48 = vadd.f32 %v1422_v3, %v5617_v55  ;;  %3746 = vmatmul.msk.bf16.vlgmr.msrb.gmra.mxu3 %vm932_vm13, %v3874_v10  ;;  %v3066_v10 = vsel %vm3065_vm15, %v5166_v35, %v5130_v7  ;;  %v2400_v35 = vld [vmem:[#allocation11 + $0x8] sm:$0xff]  ;;  %v2142_v7 = vpop.f32.mrf.mxu1 }
 0x404   : > { %2950 = vmatpush.bf16.msrb.mxu3 %v4862_v5  ;;  %v3877_v5 = vld [vmem:[#allocation10 + $0x38] sm:$0xff] }
 0x405   : > { %v1530_v8 = vadd.f32 %v5618_v33, %v1433_v61  ;;  %v1531_v41 = vadd.f32 %v5619_v23, %v1434_v48  ;;  %v3885_v3 = vld [vmem:[#allocation13 + $0x28] sm:$0xff]  ;;  %v3886_v48 = vld [vmem:[#allocation13 + $0x30] sm:$0xff] }
 0x407   : > { %v1619_v20 = vadd.f32 %v5622_v57, %v1531_v41  ;;  %v1618_v60 = vadd.f32 %v5623_v46, %v1530_v8 }
 0x408   : > { %1642 = vrot.lane.b32.xlu2 %v1620_v38, %s4338_s24  ;;  %2951 = vmatpush.bf16.msrb.mxu3 %v4877_v31  ;;  %v5244_v31 = vpop.f32.mrf.mxu0 }
 0x409   : > { %1640 = vrot.lane.b32.xlu1 %v1619_v20, %s4338_s24  ;;  %1638 = vrot.lane.b32.xlu0 %v1618_v60, %s4338_s24 }
 0x40e   : > { %3757 = vmatmul.msk.bf16.gmra.mxu0 %vm932_vm13, %v3877_v5 }
 0x40f   : > { %3758 = vmatmul.msk.bf16.vlgmr.msrb.gmra.mxu1 %vm932_vm13, %v3876_v24  ;;  %v3157_v24 = vsel %vm3153_vm14, %v5140_v51, %v5197_v47  ;;  %v5285_v47 = vpop.f32.mrf.mxu1 }
 0x410   : > { %2157 = vperm.xlu2 %4032, %v2068_v14   ;;  %3017 = vmatpush.bf16.msrb.mxu1 %v5626_v1  ;;  %v5254_v6 = vpop.f32.mrf.mxu0 }
 0x411   : > { %2152 = vperm.xlu1 %4031, %v2067_v29   ;;  %1644 = vrot.lane.b32.xlu0 %v1621_v58, %s4338_s24 }
 0x412   : > { %3768 = vmatmul.msk.bf16.vlgmr.msra.gmra.mxu2 %vm932_vm13, %v3878_v59 }
 0x413   : > { %3747 = vmatmul.msk.bf16.gmra.mxu3 %vm932_vm13, %v3875_v21  ;;  %3086 = vmatpush.bf16.msra.mxu2 %v5157_v45  ;;  %v2815_v45 = vld [vmem:[#allocation14 + $0x8] sm:$0xff] }
 0x414   : > { %3018 = vmatpush.bf16.msrb.mxu1 %v5627_v43  ;;  %v3889_v43 = vld [vmem:[#allocation13 + $0x48] sm:$0xff] }
 0x417   : > { %3087 = vmatpush.bf16.msra.mxu2 %v3066_v10  ;;  %v5293_v44 = vpop.f32.mrf.mxu1 }
 0x418   : > { %2473 = vperm.xlu2 %4032, %v2401_v52   ;;  %v5269_v15 = vpop.f32.mrf.mxu0 }
 0x419   : > { %2167 = vperm.xlu1 %4031, %v2070_v16   ;;  %2162 = vperm.xlu0 %4030, %v2069_v34  }
 0x41e   : > { %3780 = vmatmul.msk.bf16.vlgmr.msra.gmra.mxu0 %vm932_vm13, %v3880_v32 }
 0x41f   : > { %3759 = vmatmul.msk.bf16.gmra.mxu1 %vm932_vm13, %v3877_v5  ;;  %3174 = vmatpush.bf16.msra.mxu0 %v3156_v30 }
 0x420   : > { %2883 = vperm.xlu2 %4032, %v2815_v45   ;;  %v5276_v49 = vpop.f32.mrf.mxu0 }
 0x421   : > { %2468 = vperm.xlu1 %4031, %v2400_v35   ;;  %2463 = vperm.xlu0 %4030, %v2399_v36  }
 0x422   : > { %3769 = vmatmul.msk.bf16.gmra.mxu2 %vm932_vm13, %v3879_v56 }
 0x423   : > { %3770 = vmatmul.msk.bf16.vlgmr.msra.gmra.mxu3 %vm932_vm13, %v3878_v59  ;;  %3175 = vmatpush.bf16.msra.mxu0 %v3154_v25 }
 0x424   : > { %3105 = vmatpush.bf16.msra.mxu3 %v5181_v62  ;;  %v3882_v62 = vld [vmem:[#allocation13 + $0x10] sm:$0xff] }
 0x428   : > { %3106 = vmatpush.bf16.msra.mxu3 %v3067_v28 }
 0x429   : > { %2878 = vperm.xlu1 %4031, %v2814_v11   ;;  %2478 = vperm.xlu0 %4030, %v2402_v22  }
 0x42e   : > { %3781 = vmatmul.msk.bf16.gmra.mxu0 %vm932_vm13, %v3881_v0 }
 0x42f   : > { %3782 = vmatmul.msk.bf16.vlgmr.msra.gmra.mxu1 %vm932_vm13, %v3880_v32 }
 0x430   : > { %3193 = vmatpush.bf16.msra.mxu1 %v3157_v24 }
 0x431   : > { %2893 = vperm.xlu1 %4031, %v2817_v53   ;;  %2888 = vperm.xlu0 %4030, %v2816_v63  }
 0x432   : > { %3792 = vmatmul.msk.bf16.vlgmr.msrb.gmra.mxu2 %vm932_vm13, %v3882_v62 }
 0x433   : > { %3771 = vmatmul.msk.bf16.gmra.mxu3 %vm932_vm13, %v3879_v56 }
 0x434   : > { %3194 = vmatpush.bf16.msra.mxu1 %v3155_v17 }
 0x435   : > { %v5283_v51 = vpop.f32.mrf.mxu2 }
 0x43b   : > { %v5287_v19 = vpop.f32.mrf.mxu0 }
 0x43d   : > { %v2240_v21 = vpop.f32.mrf.mxu2 }
 0x43e   : > { %3804 = vmatmul.msk.bf16.vlgmr.msrb.gmra.mxu0 %vm932_vm13, %v3884_v13 }
 0x43f   : > { %3783 = vmatmul.msk.bf16.gmra.mxu1 %vm932_vm13, %v3881_v0 }
 0x442   : > { %3793 = vmatmul.msk.bf16.gmra.mxu2 %vm932_vm13, %v3883_v50 }
 0x443   : > { %v2327_v2 = vpop.f32.mrf.mxu0  ;;  %3794 = vmatmul.msk.bf16.vlgmr.msrb.gmra.mxu3 %vm932_vm13, %v3882_v62 }
 0x445   : > { %v5295_v4 = vpop.f32.mrf.mxu2 }
 0x446   : > { %v5297_v9 = vpop.f32.mrf.mxu3 }
 0x44b   : > { %v5299_v42 = vpop.f32.mrf.mxu0 }
 0x44c   : > { %v5301_v40 = vpop.f32.mrf.mxu1 }
 0x44d   : > { %v5303_v61 = vpop.f32.mrf.mxu2 }
 0x44e   : > { %3805 = vmatmul.msk.bf16.gmra.mxu0 %vm932_vm13, %v3885_v3  ;;  %v2259_v55 = vpop.f32.mrf.mxu3 }
 0x44f   : > { %3806 = vmatmul.msk.bf16.vlgmr.msrb.gmra.mxu1 %vm932_vm13, %v3884_v13 }
 0x451   : > { %v1635_v38 = vpop.permute.xlu1 %1634 }
 0x452   : > { %3816 = vmatmul.msk.bf16.vlgmr.msra.gmra.mxu2 %vm932_vm13, %v3886_v48  ;;  %v1631_v33 = vpop.permute.xlu2 %1630 }
 0x453   : > { %v5308_v8 = vpop.f32.mrf.mxu0  ;;  %3795 = vmatmul.msk.bf16.gmra.mxu3 %vm932_vm13, %v3883_v50 }
 0x454   : > { %v2346_v23 = vpop.f32.mrf.mxu1 }
 0x455   : > { %v5311_v41 = vpop.f32.mrf.mxu2 }
 0x456   : > { %v5313_v27 = vpop.f32.mrf.mxu3 }
 0x45a   : > { %v1637_v54 = vpop.permute.xlu2 %1636 }
 0x45b   : > { %v5316_v57 = vsel %vm1646_vm12, %v1635_v38, %v1637_v54  ;;  %v5318_v20 = vpop.f32.mrf.mxu0 }
 0x45c   : > { %v5320_v46 = vpop.f32.mrf.mxu1 }
 0x45d   : > { %v5322_v60 = vpop.f32.mrf.mxu2 }
 0x45e   : > { %3828 = vmatmul.msk.bf16.vlgmr.msra.gmra.mxu0 %vm932_vm13, %v3888_v18  ;;  %v5325_v5 = vpop.f32.mrf.mxu3 }
 0x45f   : > { %3807 = vmatmul.msk.bf16.gmra.mxu1 %vm932_vm13, %v3885_v3 }
 0x462   : > { %3817 = vmatmul.msk.bf16.gmra.mxu2 %vm932_vm13, %v3887_v39  ;;  %v1643_v12 = vpop.permute.xlu2 %1642 }
 0x463   : > { %v5329_v14 = vpop.f32.mrf.mxu0  ;;  %3818 = vmatmul.msk.bf16.vlgmr.msra.gmra.mxu3 %vm932_vm13, %v3886_v48 }
 0x464   : > { %v5332_v59 = vpop.f32.mrf.mxu1 }
 0x465   : > { %v5334_v29 = vpop.f32.mrf.mxu2 }
 0x466   : > { %v5336_v37 = vpop.f32.mrf.mxu3 }
 0x46a   : > { %v2158_v58 = vpop.permute.xlu2 %2157  ;;  %v1633_v1 = vpop.permute.xlu0 %1632 }
 0x46b   : > { %v2172_v10 = vadd.f32 %v2158_v58, %v5254_v6  ;;  %v2173_v52 = vadd.f32 %v2158_v58, %v2142_v7  ;;  %v5340_v16 = vsel %vm1646_vm12, %v1631_v33, %v1633_v1  ;;  %v5342_v34 = vpop.f32.mrf.mxu0 }
 0x46c   : > { %v5344_v32 = vpop.f32.mrf.mxu1 }
 0x46d   : > { %v2269_v30 = vadd.f32 %v2240_v21, %v2172_v10  ;;  %v2270_v45 = vadd.f32 %v2259_v55, %v2173_v52  ;;  %v5346_v56 = vpop.f32.mrf.mxu2 }
 0x46e   : > { %3829 = vmatmul.msk.bf16.gmra.mxu0 %vm932_vm13, %v3889_v43  ;;  %v5349_v35 = vpop.f32.mrf.mxu3 }
 0x46f   : > { %3830 = vmatmul.msk.bf16.vlgmr.msra.gmra.mxu1 %vm932_vm13, %v3888_v18  ;;  %v2356_v36 = vadd.f32 %v2327_v2, %v2269_v30  ;;  %v2357_v6 = vadd.f32 %v2346_v23, %v2270_v45 }
 0x471   : > { %2374 = vrot.lane.b32.xlu1 %v2356_v36, %s4339_s16 }
 0x473   : > { %v5353_v25 = vpop.f32.mrf.mxu0  ;;  %3819 = vmatmul.msk.bf16.gmra.mxu3 %vm932_vm13, %v3887_v39 }
 0x474   : > { %v5356_v28 = vpop.f32.mrf.mxu1 }
 0x475   : > { %v2586_v11 = vpop.f32.mrf.mxu2 }
 0x476   : > { %v5358_v22 = vpop.f32.mrf.mxu3 }
 0x47b   : > { %v2653_v0 = vpop.f32.mrf.mxu0  ;;  %v1641_v24 = vpop.permute.xlu1 %1640 }
 0x47c   : > { %v1639_v62 = vpop.permute.xlu0 %1638  ;;  %v5360_v53 = vpop.f32.mrf.mxu1 }
 0x47d   : > { %v5363_v63 = vsel %vm1646_vm12, %v1639_v62, %v1641_v24  ;;  %v2588_v7 = vpop.f32.mrf.mxu2 }
 0x47e   : > { %v5365_v17 = vpop.f32.mrf.mxu3 }
 0x47f   : > { %3831 = vmatmul.msk.bf16.gmra.mxu1 %vm932_vm13, %v3889_v43  ;;  %vm2386_vm13 = vcmask 31744  }
 0x483   : > { %v5368_v13 = vpop.f32.mrf.mxu0  ;;  %v2153_v21 = vpop.permute.xlu1 %2152 }
 0x484   : > { %v2170_v50 = vadd.f32 %v2153_v21, %v5244_v31  ;;  %v2171_v2 = vadd.f32 %v2153_v21, %v5267_v26  ;;  %v1645_v3 = vpop.permute.xlu0 %1644  ;;  %v5372_v55 = vpop.f32.mrf.mxu1 }
 0x485   : > { %v5375_v48 = vsel %vm1646_vm12, %v1643_v12, %v1645_v3  ;;  %v2591_v33 = vpop.f32.mrf.mxu2 }
 0x486   : > { %v2267_v23 = vadd.f32 %v5283_v51, %v2170_v50  ;;  %v2268_v38 = vadd.f32 %v5297_v9, %v2171_v2  ;;  %v5379_v54 = vpop.f32.mrf.mxu3 }
 0x488   : > { %v2354_v18 = vadd.f32 %v5287_v19, %v2267_v23  ;;  %v2355_v39 = vadd.f32 %v5301_v40, %v2268_v38 }
 0x48a   : > { %2370 = vrot.lane.b32.xlu2 %v2354_v18, %s4339_s16 }
 0x48b   : > { %v2658_v31 = vpop.f32.mrf.mxu0  ;;  %v2168_v26 = vpop.permute.xlu1 %2167 }
 0x48c   : > { %v2176_v58 = vadd.f32 %v2168_v26, %v5276_v49  ;;  %v2163_v1 = vpop.permute.xlu0 %2162  ;;  %v5385_v12 = vpop.f32.mrf.mxu1 }
 0x48d   : > { %v2174_v43 = vadd.f32 %v2163_v1, %v5269_v15  ;;  %v2175_v51 = vadd.f32 %v2163_v1, %v5285_v47  ;;  %v2593_v9 = vpop.f32.mrf.mxu2 }
 0x48e   : > { %v2273_v10 = vadd.f32 %v5303_v61, %v2176_v58  ;;  %v5390_v52 = vpop.f32.mrf.mxu3 }
 0x48f   : > { %v2271_v19 = vadd.f32 %v5295_v4, %v2174_v43  ;;  %v2272_v40 = vadd.f32 %v5313_v27, %v2175_v51 }
 0x490   : > { %v2360_v30 = vadd.f32 %v5308_v8, %v2273_v10 }
 0x491   : > { %v2359_v49 = vadd.f32 %v5320_v46, %v2272_v40  ;;  %v2358_v45 = vadd.f32 %v5299_v42, %v2271_v19  ;;  %v2474_v46 = vpop.permute.xlu2 %2473  ;;  %v2177_v42 = vadd.f32 %v2168_v26, %v5293_v44 }
 0x492   : > { %2382 = vrot.lane.b32.xlu2 %v2360_v30, %s4339_s16  ;;  %v2485_v50 = vadd.f32 %v2474_v46, %v5334_v29 }
 0x493   : > { %v2660_v15 = vpop.f32.mrf.mxu0  ;;  %2380 = vrot.lane.b32.xlu1 %v2359_v49, %s4339_s16  ;;  %2378 = vrot.lane.b32.xlu0 %v2358_v45, %s4339_s16  ;;  %v2469_v36 = vpop.permute.xlu1 %2468 }
 0x494   : > { %v2464_v47 = vpop.permute.xlu0 %2463  ;;  %v5400_v61 = vpop.f32.mrf.mxu1  ;;  %v2483_v62 = vadd.f32 %v2469_v36, %v5322_v60  ;;  %v2552_v60 = vadd.f32 %v5342_v34, %v2485_v50 }
 0x495   : > { %v2481_v4 = vadd.f32 %v2464_v47, %v5311_v41  ;;  %v2740_v27 = vpop.f32.mrf.mxu2  ;;  %v2274_v41 = vadd.f32 %v5325_v5, %v2177_v42 }
 0x496   : > { %v2610_v24 = vpop.f32.mrf.mxu3  ;;  %v2550_v3 = vadd.f32 %v5329_v14, %v2483_v62 }
 0x497   : > { %v2548_v8 = vadd.f32 %v5318_v20, %v2481_v4  ;;  %v2361_v26 = vadd.f32 %v5332_v59, %v2274_v41 }
 0x498   : > { %v2617_v29 = vadd.f32 %v2588_v7, %v2550_v3 }
 0x499   : > { %v2615_v21 = vadd.f32 %v2586_v11, %v2548_v8  ;;  %v2482_v11 = vadd.f32 %v2464_v47, %v5336_v37 }
 0x49a   : > { %2376 = vrot.lane.b32.xlu2 %v2357_v6, %s4339_s16  ;;  %v2684_v37 = vadd.f32 %v5368_v13, %v2617_v29 }
 0x49b   : > { %v5408_v2 = vpop.f32.mrf.mxu0  ;;  %2372 = vrot.lane.b32.xlu0 %v2355_v39, %s4339_s16  ;;  %v2682_v20 = vadd.f32 %v2653_v0, %v2615_v21  ;;  %v2619_v39 = vadd.f32 %v2591_v33, %v2552_v60  ;;  %v2549_v0 = vadd.f32 %v5344_v32, %v2482_v11  ;;  %v2484_v33 = vadd.f32 %v2469_v36, %v5349_v35  ;;  %v2879_v60 = vpop.permute.xlu1 %2878 }
 0x49c   : > { %v2677_v23 = vpop.f32.mrf.mxu1  ;;  %v2479_v38 = vpop.permute.xlu0 %2478  ;;  %v2896_v11 = vadd.f32 %v2879_v60, %v5408_v2 }
 0x49d   : > { %v2742_v18 = vpop.f32.mrf.mxu2  ;;  %v2487_v6 = vadd.f32 %v2479_v38, %v5346_v56  ;;  %v2769_v58 = vadd.f32 %v2740_v27, %v2682_v20  ;;  %v2686_v14 = vadd.f32 %v2658_v31, %v2619_v39  ;;  %v2616_v51 = vadd.f32 %v5379_v54, %v2549_v0  ;;  %v2884_v0 = vpop.permute.xlu2 %2883 }
 0x49e   : > { %v2612_v44 = vpop.f32.mrf.mxu3  ;;  %v2771_v43 = vadd.f32 %v2742_v18, %v2684_v37  ;;  %v2551_v32 = vadd.f32 %v5356_v28, %v2484_v33  ;;  %v2486_v54 = vadd.f32 %v2474_v46, %v5358_v22 }
 0x49f   : > { %v2554_v34 = vadd.f32 %v5353_v25, %v2487_v6  ;;  %v2683_v25 = vadd.f32 %v5385_v12, %v2616_v51  ;;  %v2488_v12 = vadd.f32 %v2479_v38, %v5365_v17 }
 0x4a0   : > { %v2618_v45 = vadd.f32 %v5390_v52, %v2551_v32 }
 0x4a1   : > { %v2621_v10 = vadd.f32 %v2593_v9, %v2554_v34  ;;  %v2553_v9 = vadd.f32 %v5360_v53, %v2486_v54  ;;  %v2555_v52 = vadd.f32 %v5372_v55, %v2488_v12 }
 0x4a2   : > { %2384 = vrot.lane.b32.xlu2 %v2361_v26, %s4339_s16  ;;  %v2685_v47 = vadd.f32 %v5400_v61, %v2618_v45  ;;  %s4243_s16 = scalar_lea.hbm %s5629_s29, 64 }
 0x4a3   : > { %v5418_v5 = vpop.f32.mrf.mxu0  ;;  %2785 = vrot.lane.b32.xlu0 %v2769_v58, %s4340_s30  ;;  %v2688_v13 = vadd.f32 %v2660_v15, %v2621_v10  ;;  %v2620_v28 = vadd.f32 %v2610_v24, %v2553_v9  ;;  %v2622_v53 = vadd.f32 %v2612_v44, %v2555_v52  ;;  %v741_v52 = vld [vmem:[%s4556_s26 + $0xc] sm:$0xf]  ;;  %p4245_p8 = scmp.lt.s32.totalorder %s4243_s16, %s4239_s6 }
 0x4a4   : > { %v2679_v56 = vpop.f32.mrf.mxu1  ;;  %v2898_v37 = vadd.f32 %v2884_v0, %v5418_v5  ;;  %v2889_v51 = vpop.permute.xlu0 %2888 }
 0x4a5   : > { %v2745_v7 = vpop.f32.mrf.mxu2  ;;  %v2687_v4 = vadd.f32 %v2677_v23, %v2620_v28  ;;  %v2689_v42 = vadd.f32 %v2679_v56, %v2622_v53  ;;  %p4246_p9 = por %p4245_p8, %p4244_p7 }
 0x4a6   : > { %v2773_v1 = vadd.f32 %v2745_v7, %v2686_v14  ;;  %v2759_v59 = vpop.f32.mrf.mxu3 }
 0x4a7   : > { %v2770_v30 = vadd.f32 %v2759_v59, %v2683_v25  ;;  %p4247_p10 = pnand %p4246_p9, %p4242_p6 }
 0x4a8   : > { %2793 = vrot.lane.b32.xlu1 %v2773_v1, %s4340_s30 }
 0x4aa   : > { %2789 = vrot.lane.b32.xlu2 %v2771_v43, %s4340_s30 }
 0x4ab   : > { %v5428_v31 = vpop.f32.mrf.mxu0 }
 0x4ac   : > { %v5432_v19 = vpop.f32.mrf.mxu1  ;;  %v2900_v32 = vadd.f32 %v2889_v51, %v5428_v31 }
 0x4ad   : > { %v2747_v40 = vpop.f32.mrf.mxu2  ;;  %v2897_v9 = vadd.f32 %v2879_v60, %v5432_v19 }
 0x4ae   : > { %v2775_v35 = vadd.f32 %v2747_v40, %v2688_v13  ;;  %v2761_v49 = vpop.f32.mrf.mxu3 }
 0x4af   : > { %v2772_v22 = vadd.f32 %v2761_v49, %v2685_v47 }
 0x4b0   : > { %2787 = vrot.lane.b32.xlu1 %v2770_v30, %s4340_s30  ;;  %2797 = vrot.lane.b32.xlu0 %v2775_v35, %s4340_s30 }
 0x4b3   : > { %v5440_v15 = vpop.f32.mrf.mxu0 }
 0x4b4   : > { %v5443_v36 = vpop.f32.mrf.mxu1 }
 0x4b5   : > { %v2934_v27 = vpop.f32.mrf.mxu2  ;;  %v2899_v31 = vadd.f32 %v2884_v0, %v5443_v36 }
 0x4b6   : > { %v2764_v8 = vpop.f32.mrf.mxu3  ;;  %v2963_v26 = vadd.f32 %v2934_v27, %v2896_v11 }
 0x4b7   : > { %v2774_v46 = vadd.f32 %v2764_v8, %v2687_v4 }
 0x4b8   : > { %2791 = vrot.lane.b32.xlu0 %v2772_v22, %s4340_s30 }
 0x4b9   : > { %2795 = vrot.lane.b32.xlu2 %v2774_v46, %s4340_s30 }
 0x4bb   : > { %v3001_v24 = vpop.f32.mrf.mxu0 }
 0x4bc   : > { %v5448_v17 = vpop.f32.mrf.mxu1  ;;  %v3030_v39 = vadd.f32 %v3001_v24, %v2963_v26  ;;  %v2894_v24 = vpop.permute.xlu1 %2893 }
 0x4bd   : > { %v2936_v62 = vpop.f32.mrf.mxu2 }
 0x4be   : > { %v2766_v61 = vpop.f32.mrf.mxu3  ;;  %v2965_v59 = vadd.f32 %v2936_v62, %v2898_v37  ;;  %v877_v62 = vunpack.c.l.bf16 %v741_v52 }
 0x4bf   : > { %v2776_v21 = vadd.f32 %v2766_v61, %v2689_v42 }
 0x4c1   : > { %2799 = vrot.lane.b32.xlu1 %v2776_v21, %s4340_s30 }
 0x4c3   : > { %v3003_v50 = vpop.f32.mrf.mxu0 }
 0x4c4   : > { %v5451_v41 = vpop.f32.mrf.mxu1  ;;  %v3032_v43 = vadd.f32 %v3003_v50, %v2965_v59  ;;  %v2902_v50 = vadd.f32 %v2894_v24, %v5440_v15 }
 0x4c5   : > { %v2939_v3 = vpop.f32.mrf.mxu2  ;;  %v2903_v0 = vadd.f32 %v2894_v24, %v5451_v41 }
 0x4c6   : > { %v2953_v55 = vpop.f32.mrf.mxu3  ;;  %v2967_v30 = vadd.f32 %v2939_v3, %v2900_v32  ;;  %v2901_v3 = vadd.f32 %v2889_v51, %v5448_v17 }
 0x4c7   : > { %v2964_v4 = vadd.f32 %v2953_v55, %v2897_v9 }
 0x4cb   : > { %v3006_v23 = vpop.f32.mrf.mxu0 }
 0x4cc   : > { %v3020_v20 = vpop.f32.mrf.mxu1  ;;  %v3034_v49 = vadd.f32 %v3006_v23, %v2967_v30 }
 0x4cd   : > { %v2941_v38 = vpop.f32.mrf.mxu2  ;;  %v3031_v8 = vadd.f32 %v3020_v20, %v2964_v4  ;;  %v881_v20 = vmul.f32 2.0, %v877_v62 }
 0x4ce   : > { %v2955_v18 = vpop.f32.mrf.mxu3  ;;  %v2969_v23 = vadd.f32 %v2941_v38, %v2902_v50 }
 0x4cf   : > { %v2966_v22 = vadd.f32 %v2955_v18, %v2899_v31  ;;  %v1658_v15 = vadd.f32 %v5375_v48, %v881_v20 }
 0x4d3   : > { %v3008_v44 = vpop.f32.mrf.mxu0 }
 0x4d4   : > { %v3022_v6 = vpop.f32.mrf.mxu1  ;;  %v3036_v11 = vadd.f32 %v3008_v44, %v2969_v23 }
 0x4d5   : > { %v3089_v29 = vpop.f32.mrf.mxu2  ;;  %v3033_v46 = vadd.f32 %v3022_v6, %v2966_v22 }
 0x4d6   : > { %v2958_v58 = vpop.f32.mrf.mxu3  ;;  %v3118_v14 = vadd.f32 %v3089_v29, %v3030_v39 }
 0x4d7   : > { %v2968_v18 = vadd.f32 %v2958_v58, %v2901_v3 }
 0x4db   : > { %v3177_v34 = vpop.f32.mrf.mxu0 }
 0x4dc   : > { %v3206_v56 = vadd.f32 %v3177_v34, %v3118_v14  ;;  %v3025_v7 = vpop.f32.mrf.mxu1 }
 0x4dd   : > { %v3091_v1 = vpop.f32.mrf.mxu2  ;;  %v3035_v6 = vadd.f32 %v3025_v7, %v2968_v18 }
 0x4de   : > { %3222 = vrot.lane.b32.xlu2 %v3206_v56, %s4341_s8  ;;  %v2960_v33 = vpop.f32.mrf.mxu3  ;;  %v3120_v2 = vadd.f32 %v3091_v1, %v3032_v43  ;;  %v738_v1 = vld [vmem:[%s4556_s26] sm:$0xf] }
 0x4df   : > { %v2970_v56 = vadd.f32 %v2960_v33, %v2903_v0  ;;  %v874_v43 = vunpack.c.l.bf16 %v738_v1 }
 0x4e1   : > { %v878_v51 = vmul.f32 2.0, %v874_v43 }
 0x4e3   : > { %v3179_v10 = vpop.f32.mrf.mxu0  ;;  %v2375_v30 = vpop.permute.xlu1 %2374 }
 0x4e4   : > { %v3208_v25 = vadd.f32 %v3179_v10, %v3120_v2  ;;  %v3027_v13 = vpop.f32.mrf.mxu1  ;;  %v5457_v40 = vpop.permute.xlu2 %2370  ;;  %v1655_v10 = vadd.f32 %v5340_v16, %v878_v51 }
 0x4e5   : > { %v3094_v35 = vpop.f32.mrf.mxu2  ;;  %v3037_v7 = vadd.f32 %v3027_v13, %v2970_v56 }
 0x4e6   : > { %3226 = vrot.lane.b32.xlu1 %v3208_v25, %s4341_s8  ;;  %v3108_v5 = vpop.f32.mrf.mxu3  ;;  %v3122_v54 = vadd.f32 %v3094_v35, %v3034_v49 }
 0x4e7   : > { %v3119_v53 = vadd.f32 %v3108_v5, %v3031_v8 }
 0x4eb   : > { %v3182_v45 = vpop.f32.mrf.mxu0 }
 0x4ec   : > { %v3210_v28 = vadd.f32 %v3182_v45, %v3122_v54  ;;  %v3196_v12 = vpop.f32.mrf.mxu1  ;;  %v2383_v47 = vpop.permute.xlu2 %2382 }
 0x4ed   : > { %v3207_v61 = vadd.f32 %v3196_v12, %v3119_v53  ;;  %v3096_v60 = vpop.f32.mrf.mxu2 }
 0x4ee   : > { %3230 = vrot.lane.b32.xlu0 %v3210_v28, %s4341_s8  ;;  %v3110_v27 = vpop.f32.mrf.mxu3  ;;  %v3124_v26 = vadd.f32 %v3096_v60, %v3036_v11  ;;  %v739_v28 = vld [vmem:[%s4556_s26 + $0x4] sm:$0xff]   ;;  %s5486_s26 = scalar_lea.vmem [#allocation16], %s3490_s12 }
 0x4ef   : > { %v3121_v42 = vadd.f32 %v3110_v27, %v3033_v46  ;;  %v875_v12 = vunpack.c.l.bf16 %v739_v28  ;;  %s3273_s4 = sshll.u32 %s5486_s26, 4  ;;  %s3274_s4 = int_to_ptr.vmem [resolvable:$true] %s3273_s4 }
 0x4f3   : > { %v3184_v29 = vpop.f32.mrf.mxu0 }
 0x4f4   : > { %v3198_v21 = vpop.f32.mrf.mxu1  ;;  %v2377_v19 = vpop.permute.xlu2 %2376  ;;  %v3212_v34 = vadd.f32 %v3184_v29, %v3124_v26 }
 0x4f5   : > { %v3209_v36 = vadd.f32 %v3198_v21, %v3121_v42  ;;  %v2388_v27 = vsel %vm2386_vm13, %v2375_v30, %v2377_v19 }
 0x4f6   : > { %3224 = vrot.lane.b32.xlu0 %v3207_v61, %s4341_s8  ;;  %v3113_v55 = vpop.f32.mrf.mxu3 }
 0x4f7   : > { %3228 = vrot.lane.b32.xlu2 %v3209_v36, %s4341_s8  ;;  %v3123_v39 = vadd.f32 %v3113_v55, %v3035_v6 }
 0x4fc   : > { %v3201_v17 = vpop.f32.mrf.mxu1  ;;  %v2385_v14 = vpop.permute.xlu2 %2384 }
 0x4fd   : > { %v3211_v38 = vadd.f32 %v3201_v17, %v3123_v39  ;;  %v2390_v58 = vsel %vm2386_vm13, %v2383_v47, %v2385_v14  ;;  %v879_v47 = vmul.f32 2.0, %v875_v12 }
 0x4fe   : > { %v5471_v37 = vadd.f32 %v2390_v58, %v1658_v15  ;;  %v3115_v44 = vpop.f32.mrf.mxu3 }
 0x4ff   : > { %3234 = vrot.lane.b32.xlu2 %v3212_v34, %s4341_s8  ;;  %3232 = vrot.lane.b32.xlu1 %v3211_v38, %s4341_s8  ;;  %v3125_v48 = vadd.f32 %v3115_v44, %v3037_v7 }
 0x504   : > { %v3203_v59 = vpop.f32.mrf.mxu1  ;;  %v2790_v35 = vpop.permute.xlu2 %2789 }
 0x505   : > { %v3213_v2 = vadd.f32 %v3203_v59, %v3125_v48  ;;  %v2379_v41 = vpop.permute.xlu0 %2378  ;;  %v2381_v5 = vpop.permute.xlu1 %2380 }
 0x506   : > { %v2389_v23 = vsel %vm2386_vm13, %v2379_v41, %v2381_v5 }
 0x507   : > { %3236 = vrot.lane.b32.xlu0 %v3213_v2, %s4341_s8 }
 0x50d   : > { %v2373_v32 = vpop.permute.xlu0 %2372 }
 0x50e   : > { %v2387_v33 = vsel %vm2386_vm13, %v5457_v40, %v2373_v32  ;;  %v1656_v40 = vadd.f32 %v5316_v57, %v879_v47  ;;  %v876_v57 = vunpack.c.h.bf16 %v739_v28 }
 0x50f   : > { %v2395_v25 = vadd.f32 %v2387_v33, %v1655_v10 }
 0x510   : > { %v2396_v8 = vadd.f32 %v2388_v27, %v1656_v40  ;;  %v880_v3 = vmul.f32 2.0, %v876_v57 }
 0x512   : > { %v1657_v20 = vadd.f32 %v5363_v63, %v880_v3 }
 0x513   : > { %v2796_v54 = vpop.permute.xlu2 %2795 }
 0x514   : > { %v2397_v11 = vadd.f32 %v2389_v23, %v1657_v20 }
 0x515   : > { %v2786_v49 = vpop.permute.xlu0 %2785 }
 0x51a   : > { %v2794_v13 = vpop.permute.xlu1 %2793 }
 0x51b   : > { %v2804_v60 = vsel %vm2801_vm2, %v2794_v13, %v2796_v54 }
 0x51c   : > { %v2812_v6 = vadd.f32 %v2804_v60, %v2397_v11 }
 0x522   : > { %v2788_v45 = vpop.permute.xlu1 %2787  ;;  %v2798_v9 = vpop.permute.xlu0 %2797 }
 0x523   : > { %v2802_v21 = vsel %vm2801_vm2, %v2786_v49, %v2788_v45 }
 0x524   : > { %v2810_v19 = vadd.f32 %v2802_v21, %v2395_v25 }
 0x52a   : > { %v2792_v16 = vpop.permute.xlu0 %2791 }
 0x52b   : > { %v2803_v22 = vsel %vm2801_vm2, %v2790_v35, %v2792_v16 }
 0x52c   : > { %v2811_v52 = vadd.f32 %v2803_v22, %v2396_v8 }
 0x533   : > { %v2800_v31 = vpop.permute.xlu1 %2799 }
 0x534   : > { %v2805_v17 = vsel %vm2801_vm2, %v2798_v9, %v2800_v31 }
 0x535   : > { %v2813_v63 = vadd.f32 %v2805_v17, %v5471_v37 }
 0x538   : > { %v3223_v4 = vpop.permute.xlu2 %3222 }
 0x551   : > { %v3229_v46 = vpop.permute.xlu2 %3228 }
 0x558   : > { %v3227_v53 = vpop.permute.xlu1 %3226 }
 0x559   : > { %v3240_v24 = vsel %vm3238_vm3, %v3227_v53, %v3229_v46  ;;  %v3235_v14 = vpop.permute.xlu2 %3234 }
 0x55a   : > { %v3248_v42 = vadd.f32 %v3240_v24, %v2811_v52 }
 0x55c   : > { %v3252_v62 = vmul.f32 0.5, %v3248_v42 }
 0x55e   : > { %3256 = vst [vmem:[%s5486_s26 + $0x8] sm:$0xff] %v3252_v62 }
 0x560   : > { %v3231_v61 = vpop.permute.xlu0 %3230 }
 0x568   : > { %v3225_v50 = vpop.permute.xlu0 %3224 }
 0x569   : > { %v3239_v36 = vsel %vm3238_vm3, %v3223_v4, %v3225_v50 }
 0x56a   : > { %v3247_v55 = vadd.f32 %v3239_v36, %v2810_v19 }
 0x56c   : > { %v3251_v18 = vmul.f32 0.5, %v3247_v55 }
 0x56e   : > { %3255 = vst [vmem:[%s5486_s26] sm:$0xff] %v3251_v18 }
 0x571   : > { %v3233_v29 = vpop.permute.xlu1 %3232 }
 0x572   : > { %v3241_v26 = vsel %vm3238_vm3, %v3231_v61, %v3233_v29 }
 0x573   : > { %v3249_v39 = vadd.f32 %v3241_v26, %v2812_v6 }
 0x575   : > { %v3253_v15 = vmul.f32 0.5, %v3249_v39 }
 0x577   : > { %3257 = vst [vmem:[%s5486_s26 + $0x10] sm:$0xff] %v3253_v15 }
 0x579   : > { %v3237_v0 = vpop.permute.xlu0 %3236 }
 0x57a   : > { %v3242_v34 = vsel %vm3238_vm3, %v3235_v14, %v3237_v0 }
 0x57b   : > { %v3250_v38 = vadd.f32 %v3242_v34, %v2813_v63 }
 0x57d   : > { %v3254_v58 = vmul.f32 0.5, %v3250_v38 }
 0x57f   : > { %3258 = vst [vmem:[%s5486_s26 + $0x18] sm:$0xff] %v3254_v58 }
 0x580   : > { %4250 = shalt.err (!%p4247_p10)
}
 0x581   : > { %s4342_s27 = smov 128   ;;  %s4343_s12 = smov 8  }
 0x582   : > { %3919 = dma.vmem_to_hbm [thread:$0]  (%p4447_p5), %s3274_s4, 512, %s3276_s5, %s3260_s17, %s4342_s27, %s4342_s27, %s4343_s12  }
 0x583 PF: > { %s5631_s26 = sld [smem:[#allocation22_spill]]  ;;  %p3941_p12 = pnand %p3466_p2, %p4460_p11 }
 0x585   : > { %p3942_p13 = pneg %p3941_p12 }
 0x589   : > { %s3290_s14 = sand.u32 1, %s5631_s26  }
 0x58a   : > { %s3291_s20 = scalar_lea.sflag [#allocation7], %s3290_s14 }
 0x58b   : > { %4292 = dma.done.wait (%p3942_p13), %s3291_s20, 512  }
 0x58c   : > { %4294 = vsyncadd (%p3942_p13), %s3291_s20, 4294966784  ;;  %s28_s22 = sadd.s32 1, %s4317_s22   ;;  %s5633_s7 = sld [smem:[#allocation26_spill]] }
 0x58d   : > { %p25_p0 = scmp.ge.s32.totalorder %s28_s22, 4   ;;  %s5634_s23 = sld [smem:[#allocation24_spill]] }
 0x58e   : > { %s5635_s17 = smov %s4301_s18  ;;  %s5636_s18 = smov %s4305_s19 }
 0x58f   : > { %s5638_s20 = smov %s4313_s21  ;;  %27 = sbr.rel (!%p25_p0) target bundleno = 15 (0xf), region = 288 }
 0x592   : > { %s5637_s19 = smov %s5633_s7 }
 0x593   : > { %s5639_s21 = smov %s5634_s23 }
 0x594   :  { %3297 = vsyncpa [#allocation6], 1 }
 0x595   :  { %3299 = vsyncpa [#allocation6 + $0x1], 1 }
 0x596   :  { %3300 = vsyncpa [#allocation9], 1 }
 0x597   :  { %3301 = vsyncpa [#allocation12], 1 }
 0x598   :  { %3302 = vsyncpa [#allocation15], 1 }
 0x599   :  { %3303 = vsyncpa [#allocation7], 1 }
 0x59a   :  { %3305 = vsyncpa [#allocation7 + $0x1], 1 }

</bundles_post_ra>
